<compile_context>
chip_gen: v7x
topology: tpu7x:2x2x1
jax: 0.10.0
libtpu: 0.0.40
codegen_flags: <defaults>
</compile_context>

<pallas_src>
import jax
import jax.numpy as jnp
from jax import lax
from jax.experimental import pallas as pl
from jax.experimental.pallas import tpu as pltpu


def _fused_kernel(x1_ref, x2_ref, o_ref):
    a = x1_ref[...]  # (BB, M, K) f32
    b = x2_ref[...]  # (BB, N, K) f32
    # v1 = a @ b^T per batch, expressed as a transposed contraction (no b.T relayout).
    v1 = jnp.einsum(
        "bmk,bnk->bmn", a, b, preferred_element_type=jnp.float32
    )  # (BB, M, N)
    v2 = v1 * 0.5                                          # VPU, f32
    v5 = lax.erf(v1 * 0.7071067811865476) + 1.0            # EUP/VPU, f32
    # v6 = v2 @ v5 per batch (valid because M == N, as in the torch model).
    o_ref[...] = jnp.einsum(
        "bmn,bnp->bmp", v2, v5, preferred_element_type=jnp.float32
    )


def _pick_bb(B, M, N, K, vmem_budget_bytes=8 << 20):
    """Largest divisor of B that fits the VMEM budget and keeps >= 2 grid steps."""
    # Per batch element, double-buffered f32 tiles for x1, x2 and the output.
    per_batch = 2 * (M * K + N * K + M * N) * 4
    cap = max(1, vmem_budget_bytes // per_batch)
    if B >= 2:
        cap = min(cap, max(1, B // 2))  # keep at least 2 grid steps (v7x megacore)
    cap = min(cap, B)
    for bb in range(cap, 0, -1):
        if B % bb == 0:
            return bb
    return 1


def fused_gelu_matmul(x1, x2):
    *batch, M, K = x1.shape
    N = x2.shape[-2]
    assert x2.shape[-1] == K
    assert M == N, "v2 @ v5 requires square matrices, as in the reference model"

    B = 1
    for d in batch:
        B *= d
    x1f = jnp.asarray(x1, jnp.float32).reshape(B, M, K)
    x2f = jnp.asarray(x2, jnp.float32).reshape(B, N, K)

    BB = _pick_bb(B, M, N, K)
    grid_b = B // BB

    out = pl.pallas_call(
        _fused_kernel,
        out_shape=jax.ShapeDtypeStruct((B, M, N), jnp.float32),
        grid_spec=pltpu.PrefetchScalarGridSpec(
            num_scalar_prefetch=0,
            grid=(grid_b,),
            in_specs=[
                pl.BlockSpec((BB, M, K), lambda b: (b, 0, 0)),
                pl.BlockSpec((BB, N, K), lambda b: (b, 0, 0)),
            ],
            out_specs=pl.BlockSpec((BB, M, N), lambda b: (b, 0, 0)),
        ),
        compiler_params=pltpu.CompilerParams(
            dimension_semantics=("parallel",),
        ),
    )(x1f, x2f)
    return out.reshape(*batch, M, N)


def _reference(x1, x2):
    v1 = jnp.matmul(x1, jnp.swapaxes(x2, -2, -1))
    v2 = v1 * 0.5
    v5 = lax.erf(v1 * 0.7071067811865476) + 1.0
    return jnp.matmul(v2, v5)


if __name__ == "__main__":
    # Small version of the original (1, 3, 64, 64, 64) shapes.
    key = jax.random.PRNGKey(0)
    k1, k2 = jax.random.split(key)
    shape = (1, 3, 8, 64, 64)
    x1 = jax.random.normal(k1, shape, dtype=jnp.float32)
    x2 = jax.random.normal(k2, shape, dtype=jnp.float32)

    out = fused_gelu_matmul(x1, x2)
    jax.block_until_ready(out)

    ref = _reference(x1, x2)
    assert out.shape == ref.shape == (1, 3, 8, 64, 64)
    assert jnp.allclose(out, ref, atol=1e-3, rtol=1e-3)

    print("KERNEL_OK")
</pallas_src>

<mosaic_0001>
module attributes {stable_mosaic.version = 11 : i64} {
  func.func @_fused_kernel(%arg0: i32, %arg1: memref<12x64x64xf32, #tpu.memory_space<vmem>>, %arg2: memref<12x64x64xf32, #tpu.memory_space<vmem>>, %arg3: memref<12x64x64xf32, #tpu.memory_space<vmem>>) attributes {dimension_semantics = [#tpu.dimension_semantics<parallel>], iteration_bounds = array<i64: 2>, scalar_prefetch = 0 : i64, scratch_operands = 0 : i64, tpu.core_type = #tpu.core_type<tc>, window_params = [{transform_indices = @transform_0, window_bounds = array<i64: 12, 64, 64>}, {transform_indices = @transform_1, window_bounds = array<i64: 12, 64, 64>}, {transform_indices = @transform_2, window_bounds = array<i64: 12, 64, 64>}]} {
    %c0 = arith.constant 0 : index
    %c0_0 = arith.constant 0 : index
    %c0_1 = arith.constant 0 : index
    %0 = vector.load %arg1[%c0, %c0_0, %c0_1] : memref<12x64x64xf32, #tpu.memory_space<vmem>>, vector<12x64x64xf32>
    %c0_2 = arith.constant 0 : index
    %c0_3 = arith.constant 0 : index
    %c0_4 = arith.constant 0 : index
    %1 = vector.load %arg2[%c0_2, %c0_3, %c0_4] : memref<12x64x64xf32, #tpu.memory_space<vmem>>, vector<12x64x64xf32>
    "tpu.trace_start"() <{level = 10 : i32, message = "bmk,bnk->bmn"}> : () -> ()
    %cst = arith.constant dense<0.000000e+00> : vector<12x64x64xf32>
    %2 = tpu.matmul %0, %1, %cst {dimension_numbers = #tpu.dot_dimension_numbers<[2], [2], [1], [1], [0, 0, 0, 1, 1, 1], [0], [0]>} : vector<12x64x64xf32>, vector<12x64x64xf32>, vector<12x64x64xf32> -> vector<12x64x64xf32>
    "tpu.trace_stop"() : () -> ()
    %cst_5 = arith.constant 5.000000e-01 : f32
    %3 = vector.broadcast %cst_5 : f32 to vector<12x64x64xf32>
    %4 = arith.mulf %2, %3 : vector<12x64x64xf32>
    %cst_6 = arith.constant 0.707106769 : f32
    %5 = vector.broadcast %cst_6 : f32 to vector<12x64x64xf32>
    %6 = arith.mulf %2, %5 : vector<12x64x64xf32>
    %7 = math.erf %6 : vector<12x64x64xf32>
    %cst_7 = arith.constant 1.000000e+00 : f32
    %8 = vector.broadcast %cst_7 : f32 to vector<12x64x64xf32>
    %9 = arith.addf %7, %8 : vector<12x64x64xf32>
    "tpu.trace_start"() <{level = 10 : i32, message = "bmn,bnp->bmp"}> : () -> ()
    %cst_8 = arith.constant dense<0.000000e+00> : vector<12x64x64xf32>
    %10 = tpu.matmul %4, %9, %cst_8 {dimension_numbers = #tpu.dot_dimension_numbers<[2], [1], [1], [2], [0, 0, 0, 1, 1, 2], [0], [0]>} : vector<12x64x64xf32>, vector<12x64x64xf32>, vector<12x64x64xf32> -> vector<12x64x64xf32>
    "tpu.trace_stop"() : () -> ()
    %c0_9 = arith.constant 0 : index
    %c0_10 = arith.constant 0 : index
    %c0_11 = arith.constant 0 : index
    %11 = vector.load %arg3[%c0_9, %c0_10, %c0_11] : memref<12x64x64xf32, #tpu.memory_space<vmem>>, vector<12x64x64xf32>
    tpu.vector_store %arg3[%c0_9, %c0_10, %c0_11], %10 {strides = array<i32>} : memref<12x64x64xf32, #tpu.memory_space<vmem>>, vector<12x64x64xf32>,
    return
  }
  func.func @transform_0(%arg0: i32) -> (i32, i32, i32) {
    %c0_i32 = arith.constant 0 : i32
    %c0_i32_0 = arith.constant 0 : i32
    %c0_i32_1 = arith.constant 0 : i32
    return %arg0, %c0_i32, %c0_i32_0 : i32, i32, i32
  }
  func.func @transform_1(%arg0: i32) -> (i32, i32, i32) {
    %c0_i32 = arith.constant 0 : i32
    %c0_i32_0 = arith.constant 0 : i32
    %c0_i32_1 = arith.constant 0 : i32
    return %arg0, %c0_i32, %c0_i32_0 : i32, i32, i32
  }
  func.func @transform_2(%arg0: i32) -> (i32, i32, i32) {
    %c0_i32 = arith.constant 0 : i32
    %c0_i32_0 = arith.constant 0 : i32
    %c0_i32_1 = arith.constant 0 : i32
    return %arg0, %c0_i32, %c0_i32_0 : i32, i32, i32
  }
}

</mosaic_0001>

<bundles_post_ra>
// kernel: tpu_custom_call.1
= control target key start
LH: loop header
LB: loop body
LE: loop exit
PB: predicated region body
PF: predicated region fallthrough
CT: control target
= control target key end

     0   :  { %7 = vsyncpa [#allocation3], 0  ;;  %s8003_s0 = inlined_call_operand.hbm [shape: f32[24,64,64], index: 0, kind: input, shape index: {}]   ;;  %s8004_s1 = inlined_call_operand.hbm [shape: f32[24,64,64], index: 1, kind: input, shape index: {}]   ;;  %s8005_s2 = inlined_call_operand.hbm [shape: f32[24,64,64], index: 2, kind: output, shape index: {}]  }
   0x1   :  { %9 = vsyncpa [#allocation3 + $0x1], 0 }
   0x2   :  { %10 = vsyncpa [#allocation6], 0 }
   0x3   :  { %12 = vsyncpa [#allocation6 + $0x1], 0 }
   0x4   :  { %13 = vsyncpa [#allocation4], 0 }
   0x5   :  { %15 = vsyncpa [#allocation4 + $0x1], 0  ;;  %s6624_s9 = smov 0   ;;  %s6626_s10 = smov 0  }
   0x6   :  { %s6628_s11 = smov 0   ;;  %s6630_s12 = smov 0  }
   0x7 LB: > { %s6645_s13 = sadd.s32 4294967295, %s6600_s12   ;;  %s4375_s14 = sadd.s32 4294967294, %s6600_s12   ;;  %s6600_s12 = sphi %s6630_s12, %s8022_s12   ;;  %s6596_s11 = sphi %s6628_s11, %s8021_s11   ;;  %s6592_s10 = sphi %s6626_s10, %s8020_s10   ;;  %s6588_s9 = sphi %s6624_s9, %s8019_s9  }
   0x8   : > { %s6649_s15 = sadd.s32 1, %s6600_s12   ;;  %s28_s16 = sadd.s32 1, %s6596_s11 }
   0x9   : > { %s25_s17 = ssub.s32 %s6600_s12, %s6649_s15  ;;  %p35_p0 = scmp.ne.s32.totalorder %s6596_s11, %s6592_s10 }
   0xa   : > { %p26_p1 = scmp.eq.s32.totalorder %s25_s17, 0  ;;  %p36_p2 = scmp.eq.s32.totalorder %s6600_s12, 0 }
   0xb   : > { %p41_p3 = scmp.ne.s32.totalorder %s6592_s10, %s6588_s9  ;;  %p42_p4 = scmp.eq.s32.totalorder %s6645_s13, 0 }
   0xc   : > { %s6661_s18 = scalar_select %p26_p1, %s6596_s11, %s28_s16  }
   0xd   : > { %p37_p5 = por %p36_p2, %p35_p0  ;;  %p6663_p6 = por %p42_p4, %p41_p3 }
   0xe   : > { %p91_p7 = scmp.eq.s32.totalorder %s6645_s13, 1  ;;  %p97_p8 = scmp.eq.s32.totalorder %s4375_s14, 1 }
   0xf   : > { %s8008_s19 = scalar_select %p6663_p6, 1, 0 }
  0x10   : > { %p6240_p10 = scmp.lt.s32.totalorder %s6600_s12, 2  ;;  %p6670_p11 = por %p91_p7, %p35_p0 }
  0x11   : > { %p6674_p12 = por %p97_p8, %p41_p3  ;;  %s6679_s22 = sand.u32 1, %s6596_s11  }
  0x12   : > { %s8009_s20 = scalar_select %p6670_p11, 1, 0 }
  0x13   : > { %s8010_s21 = scalar_select %p6674_p12, 1, 0 }
  0x14   : > { %s4681_s23 = smul.u32 12288, %s6600_s12  ;;  %p6690_p13 = pnand %p6240_p10, %p37_p5 }
  0x15   : > { %s6220_s24 = smul.u32 768, %s6679_s22  ;;  %s118_s3 = scalar_lea.sflag [#allocation3], %s6679_s22 }
  0x16   : > { %s6688_s27 = scalar_lea.hbm %s8003_s0, %s4681_s23  ;;  %p6472_p1 = pneg %p6690_p13 }
  0x17   : > { %s121_s29 = scalar_lea.vmem [#allocation2], %s6220_s24  ;;  %s6470_s4 = scalar_lea.hbm %s6688_s27, 12288 }
  0x18   : > { %s129_s30 = sshll.u32 %s121_s29, 4  ;;  %p6471_p0 = scmp.ne.s32.totalorder %s6688_s27, %s6470_s4  ;;  %s6696_s30 = int_to_ptr.vmem [resolvable:$true] %s129_s30 }
  0x19   : > { %s6475_s7 = scalar_lea.hbm %s8003_s0, 24576  ;;  %p6476_p4 = scmp.lt.u32.totalorder %s6688_s27, %s8003_s0 }
  0x1a   : > { %p6473_p2 = pnand %p6472_p1, %p6471_p0  ;;  %p6477_p5 = scmp.lt.u32.totalorder %s6475_s7, %s6470_s4 }
  0x1b   : > { %p6479_p8 = scmp.lt.u32.totalorder %s6470_s4, %s6688_s27 }
  0x1c   : > { %p6474_p3 = pneg %p6473_p2  ;;  %p6478_p7 = por %p6477_p5, %p6476_p4 }
  0x1e   : > { %p6480_p10 = por %p6479_p8, %p6478_p7 }
  0x20   : > { %p6481_p9 = pnand %p6480_p10, %p6474_p3 }
  0x22   : > { %6484 = shalt.err (!%p6481_p9)
}
  0x23   : > { %s6485_s16 = scalar_lea.vmem %s6696_s30, 12288  ;;  %s6602_s17 = smov [#allocation2]  }
  0x24   : > { %p6486_p0 = scmp.ne.s32.totalorder %s6696_s30, %s6485_s16  ;;  %s6490_s25 = sshll.u32 %s6602_s17, 4  ;;  %s6491_s25 = int_to_ptr.vmem [resolvable:$false] %s6490_s25 }
  0x25   : > { %s6492_s26 = scalar_lea.vmem %s6491_s25, 24576  ;;  %p6493_p11 = scmp.lt.s32.totalorder %s6696_s30, %s6491_s25 }
  0x26   : > { %p6488_p2 = pnand %p6486_p0, %p6472_p1  ;;  %p6494_p4 = scmp.lt.s32.totalorder %s6492_s26, %s6485_s16 }
  0x28   : > { %p6489_p12 = pneg %p6488_p2  ;;  %p6495_p5 = por %p6494_p4, %p6493_p11 }
  0x2a   : > { %p6496_p7 = pnand %p6495_p5, %p6489_p12 }
  0x2c   : > { %6499 = shalt.err (!%p6496_p7)
}
  0x2d   : > { %s6603_s29 = smov 128   ;;  %s6604_s4 = smov 8  }
  0x2e   : > { %6232 = dma.hbm_to_vmem [thread:$0]  (!%p6690_p13), %s6688_s27, 12288, %s6696_s30, %s118_s3, %s6603_s29, %s6603_s29, %s6604_s4  }
  0x2f   : > { %p4382_p9 = scmp.ge.s32.totalorder %s6600_s12, 1  ;;  %p159_p11 = scmp.lt.s32.totalorder %s6600_s12, 3 }
  0x30   : > { %s6740_s8 = scalar_lea.hbm %s8004_s1, %s4681_s23  ;;  %s143_s14 = scalar_lea.vmem [#allocation5], %s6220_s24 }
  0x31   : > { %p6731_p12 = pnand %p4382_p9, %p159_p11  ;;  %s151_s16 = sshll.u32 %s143_s14, 4  ;;  %s6744_s16 = int_to_ptr.vmem [resolvable:$true] %s151_s16 }
  0x32   : > { %s140_s27 = scalar_lea.sflag [#allocation6], %s6679_s22  ;;  %s6500_s30 = scalar_lea.hbm %s6740_s8, 12288 }
  0x33   : > { %p6501_p3 = scmp.ne.s32.totalorder %s6740_s8, %s6500_s30  ;;  %s6505_s23 = scalar_lea.hbm %s8004_s1, 24576 }
  0x34   : > { %p6506_p0 = scmp.lt.u32.totalorder %s6740_s8, %s8004_s1  ;;  %p6507_p2 = scmp.lt.u32.totalorder %s6505_s23, %s6500_s30 }
  0x35   : > { %p6503_p8 = pnand %p6501_p3, %p6472_p1  ;;  %p6509_p5 = scmp.lt.u32.totalorder %s6500_s30, %s6740_s8 }
  0x36   : > { %p6508_p4 = por %p6507_p2, %p6506_p0 }
  0x37   : > { %p6504_p10 = pneg %p6503_p8 }
  0x38   : > { %p6510_p7 = por %p6509_p5, %p6508_p4 }
  0x3a   : > { %p6511_p9 = pnand %p6510_p7, %p6504_p10 }
  0x3c   : > { %6514 = shalt.err (!%p6511_p9)
}
  0x3d   : > { %s6515_s24 = scalar_lea.vmem %s6744_s16, 12288  ;;  %s6605_s6 = smov [#allocation5]  }
  0x3e   : > { %p6516_p11 = scmp.ne.s32.totalorder %s6744_s16, %s6515_s24  ;;  %s6520_s7 = sshll.u32 %s6605_s6, 4  ;;  %s6521_s7 = int_to_ptr.vmem [resolvable:$false] %s6520_s7 }
  0x3f   : > { %s6522_s14 = scalar_lea.vmem %s6521_s7, 24576  ;;  %p6523_p6 = scmp.lt.s32.totalorder %s6744_s16, %s6521_s7 }
  0x40   : > { %p6518_p3 = pnand %p6516_p11, %p6472_p1  ;;  %p6524_p0 = scmp.lt.s32.totalorder %s6522_s14, %s6515_s24 }
  0x42   : > { %p6519_p8 = pneg %p6518_p3  ;;  %p6525_p2 = por %p6524_p0, %p6523_p6 }
  0x44   : > { %p6526_p4 = pnand %p6525_p2, %p6519_p8 }
  0x46   : > { %6529 = shalt.err (!%p6526_p4)
}
  0x47   : > { %6235 = dma.hbm_to_vmem [thread:$0]  (!%p6690_p13), %s6740_s8, 12288, %s6744_s16, %s140_s27, %s6603_s29, %s6603_s29, %s6604_s4  }
  0x48   : > { %163 = sbr.rel (%p6731_p12) target bundleno = 765 (0x2fd), region = 28  ;;  %s6778_s30 = sand.u32 (!%p6731_p12), 1, %s6592_s10  }
  0x49   : > { %s6781_s3 = smul.u32 (!%p6731_p12), 768, %s6778_s30  ;;  %s166_s28 = scalar_lea.sflag (!%p6731_p12), [#allocation3], %s6778_s30 }
  0x4a   : > { %p8013_p6 = scmp.ne.s32.totalorder (!%p6731_p12), %s8008_s19, 0 }
  0x4b   : > { %s6785_s17 = scalar_lea.vmem (!%p6731_p12), [#allocation2], %s6781_s3 }
  0x4f   : > { %6575 = dma.done.wait (%p8013_p6), %s166_s28, 12288  }
  0x50   : > { %6577 = vsyncadd (%p8013_p6), %s166_s28, 4294955008  ;;  %s175_s22 = scalar_lea.sflag [#allocation6], %s6778_s30  ;;  %s6793_s29 = scalar_lea.vmem [#allocation5], %s6781_s3 }
  0x51   : > { %6579 = dma.done.wait (%p8013_p6), %s175_s22, 12288  }
  0x52   : > { %6581 = vsyncadd (%p8013_p6), %s175_s22, 4294955008  ;;  %vm399_vm0 = vcmask 523264   ;;  %v303_v1 = vld [vmem:[%s6793_s29] sm:$0xff]  ;;  %v304_v2 = vld [vmem:[%s6793_s29 + $0x8] sm:$0xff]  ;;  %s7758_s19 = scalar_lea.vmem [#allocation7], %s6781_s3  ;;  %s4683_s4 = smul.u32 12288, %s6645_s13 }
  0x53   : > { %vm6801_vm1 = vmpackc.low %vm399_vm0, %vm399_vm0  ;;  %v311_v3 = vld [vmem:[%s6793_s29 + $0x40] sm:$0xff]  ;;  %v5740_v4 = vpack.c.bf16 %v304_v2, %v303_v1  ;;  %v312_v5 = vld [vmem:[%s6793_s29 + $0x48] sm:$0xff]  ;;  %s4279_s5 = sshll.u32 %s7758_s19, 4  ;;  %s4265_s27 = scalar_lea.sflag [#allocation4], %s6778_s30  ;;  %s7951_s5 = int_to_ptr.vmem [resolvable:$true] %s4279_s5 }
  0x54   : > { %v305_v6 = vld [vmem:[%s6793_s29 + $0x10] sm:$0xff]  ;;  %v306_v7 = vld [vmem:[%s6793_s29 + $0x18] sm:$0xff]  ;;  %v5764_v8 = vpack.c.bf16 %v312_v5, %v311_v3  ;;  %v207_v13 = vld [vmem:[%s6785_s17] sm:$0xff]  ;;  %s7949_s13 = scalar_lea.hbm %s8005_s2, %s4683_s4  ;;  %s6530_s23 = scalar_lea.vmem %s7951_s5, 12288 }
  0x55   : > { %v5746_v9 = vpack.c.bf16 %v306_v7, %v305_v6  ;;  %v313_v10 = vld [vmem:[%s6793_s29 + $0x50] sm:$0xff]  ;;  %v314_v11 = vld [vmem:[%s6793_s29 + $0x58] sm:$0xff]  ;;  %5742 = vmatprep.subr.msk.bf16.mxu0 %vm6801_vm1, %v5740_v4  ;;  %v215_v14 = vld [vmem:[%s6785_s17 + $0x40] sm:$0xff]  ;;  %5084 = vmatprep.mubr.msk.f32.mxu0 %vm399_vm0, %v207_v13  ;;  %p6531_p13 = scmp.ne.s32.totalorder %s7951_s5, %s6530_s23  ;;  %p8016_p1 = scmp.ne.s32.totalorder %s8009_s20, 0 }
  0x56   : > { %v5770_v12 = vpack.c.bf16 %v314_v11, %v313_v10  ;;  %5766 = vmatprep.subr.msk.bf16.mxu1 %vm6801_vm1, %v5764_v8  ;;  %5745 = vmatpush3.bf16.xpose.msk.msra.mxu0 %vm6801_vm1, %v5740_v4  ;;  %v307_v15 = vld [vmem:[%s6793_s29 + $0x20] sm:$0xff]  ;;  %v308_v16 = vld [vmem:[%s6793_s29 + $0x28] sm:$0xff]  ;;  %v309_v21 = vld [vmem:[%s6793_s29 + $0x30] sm:$0xff]  ;;  %s6606_s25 = smov [#allocation7]  }
  0x57   : > { %5769 = vmatpush3.bf16.xpose.msk.msra.mxu1 %vm6801_vm1, %v5764_v8  ;;  %5748 = vmatprep.subr.msk.bf16.mxu0 %vm6801_vm1, %v5746_v9  ;;  %v315_v17 = vld [vmem:[%s6793_s29 + $0x60] sm:$0xff]  ;;  %v316_v18 = vld [vmem:[%s6793_s29 + $0x68] sm:$0xff]  ;;  %v5752_v19 = vpack.c.bf16 %v308_v16, %v307_v15  ;;  %v310_v22 = vld [vmem:[%s6793_s29 + $0x38] sm:$0xff]  ;;  %p6532_p12 = pnand %p6531_p13, %p8016_p1  ;;  %s6534_s26 = sshll.u32 %s6606_s25, 4  ;;  %s6535_s26 = int_to_ptr.vmem [resolvable:$false] %s6534_s26 }
  0x58   : > { %5772 = vmatprep.subr.msk.bf16.mxu1 %vm6801_vm1, %v5770_v12  ;;  %5112 = vmatprep.mubr.msk.f32.mxu1 %vm399_vm0, %v215_v14  ;;  %v5776_v20 = vpack.c.bf16 %v316_v18, %v315_v17  ;;  %v317_v23 = vld [vmem:[%s6793_s29 + $0x70] sm:$0xff]  ;;  %v318_v24 = vld [vmem:[%s6793_s29 + $0x78] sm:$0xff]  ;;  %v5758_v25 = vpack.c.bf16 %v310_v22, %v309_v21  ;;  %v319_v27 = vld [vmem:[%s6793_s29 + $0x80] sm:$0xff]  ;;  %s6536_s24 = scalar_lea.vmem %s6535_s26, 24576  ;;  %p6537_p5 = scmp.lt.s32.totalorder %s7951_s5, %s6535_s26 }
  0x59   : > { %v5782_v26 = vpack.c.bf16 %v318_v24, %v317_v23  ;;  %v320_v28 = vld [vmem:[%s6793_s29 + $0x88] sm:$0xff]  ;;  %v327_v29 = vld [vmem:[%s6793_s29 + $0xc0] sm:$0xff]  ;;  %v321_v33 = vld [vmem:[%s6793_s29 + $0x90] sm:$0xff]  ;;  %p6533_p10 = pneg %p6532_p12  ;;  %p6538_p7 = scmp.lt.s32.totalorder %s6536_s24, %s6530_s23 }
  0x5a   : > { %v328_v30 = vld [vmem:[%s6793_s29 + $0xc8] sm:$0xff]  ;;  %v5788_v31 = vpack.c.bf16 %v320_v28, %v319_v27  ;;  %v322_v34 = vld [vmem:[%s6793_s29 + $0x98] sm:$0xff]  ;;  %v329_v36 = vld [vmem:[%s6793_s29 + $0xd0] sm:$0xff] }
  0x5b   : > { %v5812_v32 = vpack.c.bf16 %v328_v30, %v327_v29  ;;  %v208_v35 = vld [vmem:[%s6785_s17 + $0x8] sm:$0xff]  ;;  %v330_v37 = vld [vmem:[%s6793_s29 + $0xd8] sm:$0xff]  ;;  %v209_v39 = vld [vmem:[%s6785_s17 + $0x10] sm:$0xff]  ;;  %v5794_v40 = vpack.c.bf16 %v322_v34, %v321_v33  ;;  %p6539_p9 = por %p6538_p7, %p6537_p5 }
  0x5c   : > { %v216_v38 = vld [vmem:[%s6785_s17 + $0x48] sm:$0xff]  ;;  %v217_v41 = vld [vmem:[%s6785_s17 + $0x50] sm:$0xff]  ;;  %v5818_v42 = vpack.c.bf16 %v330_v37, %v329_v36  ;;  %v210_v43 = vld [vmem:[%s6785_s17 + $0x18] sm:$0xff] }
  0x5d   : > { %v218_v44 = vld [vmem:[%s6785_s17 + $0x58] sm:$0xff]  ;;  %v211_v45 = vld [vmem:[%s6785_s17 + $0x20] sm:$0xff]  ;;  %v324_v48 = vld [vmem:[%s6793_s29 + $0xa8] sm:$0xff]  ;;  %p6540_p11 = pnand %p6539_p9, %p6533_p10 }
  0x5e   : > { %5751 = vmatpush3.bf16.xpose.msk.msra.mxu0 %vm6801_vm1, %v5746_v9  ;;  %v219_v46 = vld [vmem:[%s6785_s17 + $0x60] sm:$0xff]  ;;  %v212_v49 = vld [vmem:[%s6785_s17 + $0x28] sm:$0xff]  ;;  %v213_v53 = vld [vmem:[%s6785_s17 + $0x30] sm:$0xff] }
  0x5f   : > { %5775 = vmatpush3.bf16.xpose.msk.msra.mxu1 %vm6801_vm1, %v5770_v12  ;;  %5754 = vmatprep.subr.msk.bf16.mxu0 %vm6801_vm1, %v5752_v19  ;;  %v323_v47 = vld [vmem:[%s6793_s29 + $0xa0] sm:$0xff]  ;;  %v332_v51 = vld [vmem:[%s6793_s29 + $0xe8] sm:$0xff]  ;;  %v221_v55 = vld [vmem:[%s6785_s17 + $0x70] sm:$0xff] }
  0x60   : > { %5778 = vmatprep.subr.msk.bf16.mxu1 %vm6801_vm1, %v5776_v20  ;;  %v331_v50 = vld [vmem:[%s6793_s29 + $0xe0] sm:$0xff]  ;;  %v220_v52 = vld [vmem:[%s6785_s17 + $0x68] sm:$0xff]  ;;  %v5800_v54 = vpack.c.bf16 %v324_v48, %v323_v47  ;;  %v214_v57 = vld [vmem:[%s6785_s17 + $0x38] sm:$0xff] }
  0x61   : > { %v5824_v56 = vpack.c.bf16 %v332_v51, %v331_v50  ;;  %v222_v58 = vld [vmem:[%s6785_s17 + $0x78] sm:$0xff]  ;;  %v223_v59 = vld [vmem:[%s6785_s17 + $0x80] sm:$0xff]  ;;  %v325_v60 = vld [vmem:[%s6793_s29 + $0xb0] sm:$0xff] }
  0x62   : > { %v326_v61 = vld [vmem:[%s6793_s29 + $0xb8] sm:$0xff]  ;;  %v231_v62 = vld [vmem:[%s6785_s17 + $0xc0] sm:$0xff]  ;;  %v333_v63 = vld [vmem:[%s6793_s29 + $0xf0] sm:$0xff] }
  0x63   : > { %v334_v1 = vld [vmem:[%s6793_s29 + $0xf8] sm:$0xff]  ;;  %v5806_v2 = vpack.c.bf16 %v326_v61, %v325_v60  ;;  %v335_v4 = vld [vmem:[%s6793_s29 + $0x100] sm:$0xff]  ;;  %v336_v5 = vld [vmem:[%s6793_s29 + $0x108] sm:$0xff] }
  0x64   : > { %v5830_v3 = vpack.c.bf16 %v334_v1, %v333_v63  ;;  %v343_v6 = vld [vmem:[%s6793_s29 + $0x140] sm:$0xff]  ;;  %v344_v7 = vld [vmem:[%s6793_s29 + $0x148] sm:$0xff]  ;;  %v5836_v8 = vpack.c.bf16 %v336_v5, %v335_v4  ;;  %v337_v10 = vld [vmem:[%s6793_s29 + $0x110] sm:$0xff] }
  0x65   : > { %v5860_v9 = vpack.c.bf16 %v344_v7, %v343_v6  ;;  %v338_v11 = vld [vmem:[%s6793_s29 + $0x118] sm:$0xff]  ;;  %v224_v12 = vld [vmem:[%s6785_s17 + $0x88] sm:$0xff]  ;;  %v345_v13 = vld [vmem:[%s6793_s29 + $0x150] sm:$0xff] }
  0x66   : > { %5757 = vmatpush3.bf16.xpose.msk.msra.mxu0 %vm6801_vm1, %v5752_v19  ;;  %v346_v14 = vld [vmem:[%s6793_s29 + $0x158] sm:$0xff]  ;;  %v232_v15 = vld [vmem:[%s6785_s17 + $0xc8] sm:$0xff]  ;;  %v225_v16 = vld [vmem:[%s6785_s17 + $0x90] sm:$0xff]  ;;  %v5842_v17 = vpack.c.bf16 %v338_v11, %v337_v10 }
  0x67   : > { %5781 = vmatpush3.bf16.xpose.msk.msra.mxu1 %vm6801_vm1, %v5776_v20  ;;  %5760 = vmatprep.subr.msk.bf16.mxu0 %vm6801_vm1, %v5758_v25  ;;  %v233_v18 = vld [vmem:[%s6785_s17 + $0xd0] sm:$0xff]  ;;  %v5866_v19 = vpack.c.bf16 %v346_v14, %v345_v13  ;;  %v226_v20 = vld [vmem:[%s6785_s17 + $0x98] sm:$0xff]  ;;  %v227_v22 = vld [vmem:[%s6785_s17 + $0xa0] sm:$0xff] }
  0x68   : > { %5784 = vmatprep.subr.msk.bf16.mxu1 %vm6801_vm1, %v5782_v26  ;;  %v234_v21 = vld [vmem:[%s6785_s17 + $0xd8] sm:$0xff]  ;;  %v235_v23 = vld [vmem:[%s6785_s17 + $0xe0] sm:$0xff]  ;;  %v348_v28 = vld [vmem:[%s6793_s29 + $0x168] sm:$0xff] }
  0x69   : > { %v339_v24 = vld [vmem:[%s6793_s29 + $0x120] sm:$0xff]  ;;  %v236_v29 = vld [vmem:[%s6785_s17 + $0xe8] sm:$0xff]  ;;  %v229_v30 = vld [vmem:[%s6785_s17 + $0xb0] sm:$0xff] }
  0x6a   : > { %v347_v27 = vld [vmem:[%s6793_s29 + $0x160] sm:$0xff]  ;;  %v230_v34 = vld [vmem:[%s6785_s17 + $0xb8] sm:$0xff]  ;;  %v341_v37 = vld [vmem:[%s6793_s29 + $0x130] sm:$0xff] }
  0x6b   : > { %v5872_v33 = vpack.c.bf16 %v348_v28, %v347_v27  ;;  %v239_v36 = vld [vmem:[%s6785_s17 + $0x100] sm:$0xff]  ;;  %v360_v47 = vld [vmem:[%s6793_s29 + $0x1c8] sm:$0xff]  ;;  %v353_v50 = vld [vmem:[%s6793_s29 + $0x190] sm:$0xff] }
  0x6c   : > { %v354_v51 = vld [vmem:[%s6793_s29 + $0x198] sm:$0xff]  ;;  %v251_v63 = vld [vmem:[%s6785_s17 + $0x160] sm:$0xff]  ;;  %v364_v5 = vld [vmem:[%s6793_s29 + $0x1e8] sm:$0xff] }
  0x6d   : > { %v242_v60 = vld [vmem:[%s6785_s17 + $0x118] sm:$0xff]  ;;  %v355_v1 = vld [vmem:[%s6793_s29 + $0x1a0] sm:$0xff]  ;;  %v252_v6 = vld [vmem:[%s6785_s17 + $0x168] sm:$0xff] }
  0x6e   : > { %5763 = vmatpush3.bf16.xpose.msk.msra.mxu0 %vm6801_vm1, %v5758_v25  ;;  %v340_v25 = vld [vmem:[%s6793_s29 + $0x128] sm:$0xff]  ;;  %v250_v61 = vld [vmem:[%s6785_s17 + $0x158] sm:$0xff]  ;;  %v363_v4 = vld [vmem:[%s6793_s29 + $0x1e0] sm:$0xff] }
  0x6f   : > { %5787 = vmatpush3.bf16.xpose.msk.msra.mxu1 %vm6801_vm1, %v5782_v26  ;;  %5790 = vmatprep.subr.msk.bf16.mxu0 %vm6801_vm1, %v5788_v31  ;;  %v228_v26 = vld [vmem:[%s6785_s17 + $0xa8] sm:$0xff]  ;;  %v245_v7 = vld [vmem:[%s6785_s17 + $0x130] sm:$0xff]  ;;  %v5920_v10 = vpack.c.bf16 %v364_v5, %v363_v4  ;;  %v246_v11 = vld [vmem:[%s6785_s17 + $0x138] sm:$0xff] }
  0x70   : > { %5814 = vmatprep.subr.msk.bf16.mxu1 %vm6801_vm1, %v5812_v32  ;;  %v255_v13 = vld [vmem:[%s6785_s17 + $0x180] sm:$0xff]  ;;  %v357_v14 = vld [vmem:[%s6793_s29 + $0x1b0] sm:$0xff]  ;;  %v370_v28 = vld [vmem:[%s6793_s29 + $0x218] sm:$0xff] }
  0x71   : > { %v369_v27 = vld [vmem:[%s6793_s29 + $0x210] sm:$0xff]  ;;  %v386_v5 = vld [vmem:[%s6793_s29 + $0x298] sm:$0xff] }
  0x72   : > { %v385_v4 = vld [vmem:[%s6793_s29 + $0x290] sm:$0xff]  ;;  %v298_v0 = vld [vmem:[%s6785_s17 + $0x2d8] sm:$0xff] }
  0x75   : > { %5085 = vmatmul.mubr.msk.f32.vlgmr.msra.gmra.mrb[0].mxu0 %vm399_vm0, %v208_v35  ;;  %v238_v35 = vld [vmem:[%s6785_s17 + $0xf8] sm:$0xff] }
  0x76   : > { %5113 = vmatmul.mubr.msk.f32.vlgmr.msra.gmra.mrb[0].mxu1 %vm399_vm0, %v216_v38  ;;  %5793 = vmatpush3.bf16.xpose.msk.msra.mxu0 %vm6801_vm1, %v5788_v31  ;;  %v5848_v31 = vpack.c.bf16 %v340_v25, %v339_v24  ;;  %v342_v38 = vld [vmem:[%s6793_s29 + $0x138] sm:$0xff]  ;;  %v376_v24 = vld [vmem:[%s6793_s29 + $0x248] sm:$0xff] }
  0x77   : > { %5817 = vmatpush3.bf16.xpose.msk.msra.mxu1 %vm6801_vm1, %v5812_v32  ;;  %5087 = vmatprep.mubr.msk.f32.mxu0 %vm399_vm0, %v209_v39  ;;  %v237_v32 = vld [vmem:[%s6785_s17 + $0xf0] sm:$0xff]  ;;  %v247_v39 = vld [vmem:[%s6785_s17 + $0x140] sm:$0xff] }
  0x78   : > { %5115 = vmatprep.mubr.msk.f32.mxu1 %vm399_vm0, %v217_v41  ;;  %5796 = vmatprep.subr.msk.bf16.mxu0 %vm6801_vm1, %v5794_v40  ;;  %v350_v41 = vld [vmem:[%s6793_s29 + $0x178] sm:$0xff] }
  0x79   : > { %5088 = vmatmul.mubr.msk.f32.gmra.mrb[2].mxu0 %vm399_vm0, %v210_v43  ;;  %5820 = vmatprep.subr.msk.bf16.mxu1 %vm6801_vm1, %v5818_v42 }
  0x7a   : > { %5116 = vmatmul.mubr.msk.f32.gmra.mrb[2].mxu1 %vm399_vm0, %v218_v44  ;;  %5090 = vmatprep.mubr.msk.f32.mxu0 %vm399_vm0, %v211_v45  ;;  %v351_v44 = vld [vmem:[%s6793_s29 + $0x180] sm:$0xff]  ;;  %v352_v45 = vld [vmem:[%s6793_s29 + $0x188] sm:$0xff] }
  0x7b   : > { %5118 = vmatprep.mubr.msk.f32.mxu1 %vm399_vm0, %v219_v46  ;;  %v359_v46 = vld [vmem:[%s6793_s29 + $0x1c0] sm:$0xff]  ;;  %v5884_v48 = vpack.c.bf16 %v352_v45, %v351_v44  ;;  %v380_v45 = vld [vmem:[%s6793_s29 + $0x268] sm:$0xff] }
  0x7c   : > { %v379_v44 = vld [vmem:[%s6793_s29 + $0x260] sm:$0xff] }
  0x7d   : > { %5091 = vmatmul.mubr.msk.f32.gmra.mrb[4].mxu0 %vm399_vm0, %v212_v49  ;;  %v5908_v49 = vpack.c.bf16 %v360_v47, %v359_v46  ;;  %v268_v46 = vld [vmem:[%s6785_s17 + $0x1e8] sm:$0xff]  ;;  %v261_v47 = vld [vmem:[%s6785_s17 + $0x1b0] sm:$0xff] }
  0x7e   : > { %5119 = vmatmul.mubr.msk.f32.gmra.mrb[4].mxu1 %vm399_vm0, %v220_v52  ;;  %5799 = vmatpush3.bf16.xpose.msk.msra.mxu0 %vm6801_vm1, %v5794_v40  ;;  %v349_v40 = vld [vmem:[%s6793_s29 + $0x170] sm:$0xff]  ;;  %v240_v52 = vld [vmem:[%s6785_s17 + $0x108] sm:$0xff] }
  0x7f   : > { %5823 = vmatpush3.bf16.xpose.msk.msra.mxu1 %vm6801_vm1, %v5818_v42  ;;  %5093 = vmatprep.mubr.msk.f32.mxu0 %vm399_vm0, %v213_v53  ;;  %v5854_v42 = vpack.c.bf16 %v342_v38, %v341_v37  ;;  %v5878_v43 = vpack.c.bf16 %v350_v41, %v349_v40  ;;  %v361_v53 = vld [vmem:[%s6793_s29 + $0x1d0] sm:$0xff]  ;;  %v258_v37 = vld [vmem:[%s6785_s17 + $0x198] sm:$0xff]  ;;  %v267_v40 = vld [vmem:[%s6785_s17 + $0x1e0] sm:$0xff] }
  0x80   : > { %5121 = vmatprep.mubr.msk.f32.mxu1 %vm399_vm0, %v221_v55  ;;  %5802 = vmatprep.subr.msk.bf16.mxu0 %vm6801_vm1, %v5800_v54  ;;  %v248_v55 = vld [vmem:[%s6785_s17 + $0x148] sm:$0xff]  ;;  %v266_v38 = vld [vmem:[%s6785_s17 + $0x1d8] sm:$0xff]  ;;  %v371_v41 = vld [vmem:[%s6793_s29 + $0x220] sm:$0xff] }
  0x81   : > { %5094 = vmatmul.mubr.msk.f32.gmra.mrb[6].mxu0 %vm399_vm0, %v214_v57  ;;  %5826 = vmatprep.subr.msk.bf16.mxu1 %vm6801_vm1, %v5824_v56  ;;  %v5890_v57 = vpack.c.bf16 %v354_v51, %v353_v50  ;;  %v5968_v50 = vpack.c.bf16 %v380_v45, %v379_v44  ;;  %v262_v51 = vld [vmem:[%s6785_s17 + $0x1b8] sm:$0xff]  ;;  %v299_v44 = vld [vmem:[%s6785_s17 + $0x2e0] sm:$0xff]  ;;  %v292_v45 = vld [vmem:[%s6785_s17 + $0x2a8] sm:$0xff] }
  0x82   : > { %5122 = vmatmul.mubr.msk.f32.gmra.mrb[6].mxu1 %vm399_vm0, %v222_v58  ;;  %5140 = vmatprep.mubr.msk.f32.mxu0 %vm399_vm0, %v223_v59  ;;  %v249_v58 = vld [vmem:[%s6785_s17 + $0x150] sm:$0xff] }
  0x83   : > { %5168 = vmatprep.mubr.msk.f32.mxu1 %vm399_vm0, %v231_v62  ;;  %v243_v62 = vld [vmem:[%s6785_s17 + $0x120] sm:$0xff] }
  0x86   : > { %5805 = vmatpush3.bf16.xpose.msk.msra.mxu0 %vm6801_vm1, %v5800_v54  ;;  %v362_v54 = vld [vmem:[%s6793_s29 + $0x1d8] sm:$0xff] }
  0x87   : > { %5829 = vmatpush3.bf16.xpose.msk.msra.mxu1 %vm6801_vm1, %v5824_v56  ;;  %5808 = vmatprep.subr.msk.bf16.mxu0 %vm6801_vm1, %v5806_v2  ;;  %v241_v56 = vld [vmem:[%s6785_s17 + $0x110] sm:$0xff]  ;;  %v5914_v59 = vpack.c.bf16 %v362_v54, %v361_v53  ;;  %v271_v53 = vld [vmem:[%s6785_s17 + $0x200] sm:$0xff] }
  0x88   : > { %5832 = vmatprep.subr.msk.bf16.mxu1 %vm6801_vm1, %v5830_v3  ;;  %v373_v54 = vld [vmem:[%s6793_s29 + $0x230] sm:$0xff] }
  0x8e   : > { %5811 = vmatpush3.bf16.xpose.msk.msra.mxu0 %vm6801_vm1, %v5806_v2  ;;  %v356_v2 = vld [vmem:[%s6793_s29 + $0x1a8] sm:$0xff] }
  0x8f   : > { %5835 = vmatpush3.bf16.xpose.msk.msra.mxu1 %vm6801_vm1, %v5830_v3  ;;  %5838 = vmatprep.subr.msk.bf16.mxu0 %vm6801_vm1, %v5836_v8  ;;  %v244_v3 = vld [vmem:[%s6785_s17 + $0x128] sm:$0xff] }
  0x90   : > { %5862 = vmatprep.subr.msk.bf16.mxu1 %vm6801_vm1, %v5860_v9 }
  0x95   : > { %5141 = vmatmul.mubr.msk.f32.vlgmr.msra.gmra.mrb[8].mxu0 %vm399_vm0, %v224_v12  ;;  %v254_v12 = vld [vmem:[%s6785_s17 + $0x178] sm:$0xff] }
  0x96   : > { %5169 = vmatmul.mubr.msk.f32.vlgmr.msra.gmra.mrb[8].mxu1 %vm399_vm0, %v232_v15  ;;  %5841 = vmatpush3.bf16.xpose.msk.msra.mxu0 %vm6801_vm1, %v5836_v8  ;;  %v5896_v8 = vpack.c.bf16 %v356_v2, %v355_v1  ;;  %v358_v15 = vld [vmem:[%s6793_s29 + $0x1b8] sm:$0xff]  ;;  %v392_v1 = vld [vmem:[%s6793_s29 + $0x2c8] sm:$0xff] }
  0x97   : > { %5865 = vmatpush3.bf16.xpose.msk.msra.mxu1 %vm6801_vm1, %v5860_v9  ;;  %5143 = vmatprep.mubr.msk.f32.mxu0 %vm399_vm0, %v225_v16  ;;  %v253_v9 = vld [vmem:[%s6785_s17 + $0x170] sm:$0xff]  ;;  %v263_v16 = vld [vmem:[%s6785_s17 + $0x1c0] sm:$0xff] }
  0x98   : > { %5171 = vmatprep.mubr.msk.f32.mxu1 %vm399_vm0, %v233_v18  ;;  %5844 = vmatprep.subr.msk.bf16.mxu0 %vm6801_vm1, %v5842_v17  ;;  %v366_v18 = vld [vmem:[%s6793_s29 + $0x1f8] sm:$0xff] }
  0x99   : > { %5144 = vmatmul.mubr.msk.f32.gmra.mrb[10].mxu0 %vm399_vm0, %v226_v20  ;;  %5868 = vmatprep.subr.msk.bf16.mxu1 %vm6801_vm1, %v5866_v19 }
  0x9a   : > { %5172 = vmatmul.mubr.msk.f32.gmra.mrb[10].mxu1 %vm399_vm0, %v234_v21  ;;  %5146 = vmatprep.mubr.msk.f32.mxu0 %vm399_vm0, %v227_v22  ;;  %v367_v21 = vld [vmem:[%s6793_s29 + $0x200] sm:$0xff]  ;;  %v368_v22 = vld [vmem:[%s6793_s29 + $0x208] sm:$0xff] }
  0x9b   : > { %5174 = vmatprep.mubr.msk.f32.mxu1 %vm399_vm0, %v235_v23  ;;  %v375_v23 = vld [vmem:[%s6793_s29 + $0x240] sm:$0xff]  ;;  %v5932_v25 = vpack.c.bf16 %v368_v22, %v367_v21  ;;  %v396_v22 = vld [vmem:[%s6793_s29 + $0x2e8] sm:$0xff] }
  0x9c   : > { %v395_v21 = vld [vmem:[%s6793_s29 + $0x2e0] sm:$0xff] }
  0x9d   : > { %5147 = vmatmul.mubr.msk.f32.gmra.mrb[12].mxu0 %vm399_vm0, %v228_v26  ;;  %v5956_v26 = vpack.c.bf16 %v376_v24, %v375_v23  ;;  %v284_v23 = vld [vmem:[%s6785_s17 + $0x268] sm:$0xff]  ;;  %v277_v24 = vld [vmem:[%s6785_s17 + $0x230] sm:$0xff] }
  0x9e   : > { %5175 = vmatmul.mubr.msk.f32.gmra.mrb[12].mxu1 %vm399_vm0, %v236_v29  ;;  %5847 = vmatpush3.bf16.xpose.msk.msra.mxu0 %vm6801_vm1, %v5842_v17  ;;  %v365_v17 = vld [vmem:[%s6793_s29 + $0x1f0] sm:$0xff]  ;;  %v256_v29 = vld [vmem:[%s6785_s17 + $0x188] sm:$0xff] }
  0x9f   : > { %5871 = vmatpush3.bf16.xpose.msk.msra.mxu1 %vm6801_vm1, %v5866_v19  ;;  %5149 = vmatprep.mubr.msk.f32.mxu0 %vm399_vm0, %v229_v30  ;;  %v5902_v19 = vpack.c.bf16 %v358_v15, %v357_v14  ;;  %v5926_v20 = vpack.c.bf16 %v366_v18, %v365_v17  ;;  %v377_v30 = vld [vmem:[%s6793_s29 + $0x250] sm:$0xff]  ;;  %v274_v14 = vld [vmem:[%s6785_s17 + $0x218] sm:$0xff]  ;;  %v283_v17 = vld [vmem:[%s6785_s17 + $0x260] sm:$0xff] }
  0xa0   : > { %5177 = vmatprep.mubr.msk.f32.mxu1 %vm399_vm0, %v237_v32  ;;  %5850 = vmatprep.subr.msk.bf16.mxu0 %vm6801_vm1, %v5848_v31  ;;  %v264_v32 = vld [vmem:[%s6785_s17 + $0x1c8] sm:$0xff]  ;;  %v282_v15 = vld [vmem:[%s6785_s17 + $0x258] sm:$0xff]  ;;  %v387_v18 = vld [vmem:[%s6793_s29 + $0x2a0] sm:$0xff] }
  0xa1   : > { %5150 = vmatmul.mubr.msk.f32.gmra.mrb[14].mxu0 %vm399_vm0, %v230_v34  ;;  %5874 = vmatprep.subr.msk.bf16.mxu1 %vm6801_vm1, %v5872_v33  ;;  %v5938_v34 = vpack.c.bf16 %v370_v28, %v369_v27  ;;  %v6016_v27 = vpack.c.bf16 %v396_v22, %v395_v21  ;;  %v278_v28 = vld [vmem:[%s6785_s17 + $0x238] sm:$0xff] }
  0xa2   : > { %5178 = vmatmul.mubr.msk.f32.gmra.mrb[14].mxu1 %vm399_vm0, %v238_v35  ;;  %5196 = vmatprep.mubr.msk.f32.mxu0 %vm399_vm0, %v239_v36  ;;  %v265_v35 = vld [vmem:[%s6785_s17 + $0x1d0] sm:$0xff] }
  0xa3   : > { %5224 = vmatprep.mubr.msk.f32.mxu1 %vm399_vm0, %v247_v39  ;;  %v259_v39 = vld [vmem:[%s6785_s17 + $0x1a0] sm:$0xff] }
  0xa6   : > { %5853 = vmatpush3.bf16.xpose.msk.msra.mxu0 %vm6801_vm1, %v5848_v31  ;;  %v378_v31 = vld [vmem:[%s6793_s29 + $0x258] sm:$0xff] }
  0xa7   : > { %5877 = vmatpush3.bf16.xpose.msk.msra.mxu1 %vm6801_vm1, %v5872_v33  ;;  %5856 = vmatprep.subr.msk.bf16.mxu0 %vm6801_vm1, %v5854_v42  ;;  %v257_v33 = vld [vmem:[%s6785_s17 + $0x190] sm:$0xff]  ;;  %v5962_v36 = vpack.c.bf16 %v378_v31, %v377_v30  ;;  %v287_v30 = vld [vmem:[%s6785_s17 + $0x280] sm:$0xff] }
  0xa8   : > { %5880 = vmatprep.subr.msk.bf16.mxu1 %vm6801_vm1, %v5878_v43  ;;  %v389_v31 = vld [vmem:[%s6793_s29 + $0x2b0] sm:$0xff] }
  0xae   : > { %5859 = vmatpush3.bf16.xpose.msk.msra.mxu0 %vm6801_vm1, %v5854_v42  ;;  %v372_v42 = vld [vmem:[%s6793_s29 + $0x228] sm:$0xff] }
  0xaf   : > { %5883 = vmatpush3.bf16.xpose.msk.msra.mxu1 %vm6801_vm1, %v5878_v43  ;;  %5886 = vmatprep.subr.msk.bf16.mxu0 %vm6801_vm1, %v5884_v48  ;;  %v260_v43 = vld [vmem:[%s6785_s17 + $0x1a8] sm:$0xff] }
  0xb0   : > { %5910 = vmatprep.subr.msk.bf16.mxu1 %vm6801_vm1, %v5908_v49 }
  0xb5   : > { %5197 = vmatmul.mubr.msk.f32.vlgmr.msra.gmra.mrb[16].mxu0 %vm399_vm0, %v240_v52  ;;  %v270_v52 = vld [vmem:[%s6785_s17 + $0x1f8] sm:$0xff] }
  0xb6   : > { %5225 = vmatmul.mubr.msk.f32.vlgmr.msra.gmra.mrb[16].mxu1 %vm399_vm0, %v248_v55  ;;  %5889 = vmatpush3.bf16.xpose.msk.msra.mxu0 %vm6801_vm1, %v5884_v48  ;;  %v5944_v48 = vpack.c.bf16 %v372_v42, %v371_v41  ;;  %v374_v55 = vld [vmem:[%s6793_s29 + $0x238] sm:$0xff]  ;;  %v297_v41 = vld [vmem:[%s6785_s17 + $0x2d0] sm:$0xff] }
  0xb7   : > { %5913 = vmatpush3.bf16.xpose.msk.msra.mxu1 %vm6801_vm1, %v5908_v49  ;;  %5199 = vmatprep.mubr.msk.f32.mxu0 %vm399_vm0, %v241_v56  ;;  %v269_v49 = vld [vmem:[%s6785_s17 + $0x1f0] sm:$0xff]  ;;  %v279_v56 = vld [vmem:[%s6785_s17 + $0x240] sm:$0xff]  ;;  %v290_v42 = vld [vmem:[%s6785_s17 + $0x298] sm:$0xff] }
  0xb8   : > { %5227 = vmatprep.mubr.msk.f32.mxu1 %vm399_vm0, %v249_v58  ;;  %5892 = vmatprep.subr.msk.bf16.mxu0 %vm6801_vm1, %v5890_v57  ;;  %v382_v58 = vld [vmem:[%s6793_s29 + $0x278] sm:$0xff] }
  0xb9   : > { %5200 = vmatmul.mubr.msk.f32.gmra.mrb[18].mxu0 %vm399_vm0, %v242_v60  ;;  %5916 = vmatprep.subr.msk.bf16.mxu1 %vm6801_vm1, %v5914_v59 }
  0xba   : > { %5228 = vmatmul.mubr.msk.f32.gmra.mrb[18].mxu1 %vm399_vm0, %v250_v61  ;;  %5202 = vmatprep.mubr.msk.f32.mxu0 %vm399_vm0, %v243_v62  ;;  %v383_v61 = vld [vmem:[%s6793_s29 + $0x280] sm:$0xff]  ;;  %v384_v62 = vld [vmem:[%s6793_s29 + $0x288] sm:$0xff] }
  0xbb   : > { %5230 = vmatprep.mubr.msk.f32.mxu1 %vm399_vm0, %v251_v63  ;;  %v391_v63 = vld [vmem:[%s6793_s29 + $0x2c0] sm:$0xff]  ;;  %v5980_v2 = vpack.c.bf16 %v384_v62, %v383_v61 }
  0xbd   : > { %5203 = vmatmul.mubr.msk.f32.gmra.mrb[20].mxu0 %vm399_vm0, %v244_v3  ;;  %v6004_v3 = vpack.c.bf16 %v392_v1, %v391_v63 }
  0xbe   : > { %5231 = vmatmul.mubr.msk.f32.gmra.mrb[20].mxu1 %vm399_vm0, %v252_v6  ;;  %5895 = vmatpush3.bf16.xpose.msk.msra.mxu0 %vm6801_vm1, %v5890_v57  ;;  %v381_v57 = vld [vmem:[%s6793_s29 + $0x270] sm:$0xff]  ;;  %v272_v6 = vld [vmem:[%s6785_s17 + $0x208] sm:$0xff] }
  0xbf   : > { %5919 = vmatpush3.bf16.xpose.msk.msra.mxu1 %vm6801_vm1, %v5914_v59  ;;  %5205 = vmatprep.mubr.msk.f32.mxu0 %vm399_vm0, %v245_v7  ;;  %v5950_v59 = vpack.c.bf16 %v374_v55, %v373_v54  ;;  %v5974_v60 = vpack.c.bf16 %v382_v58, %v381_v57  ;;  %v393_v7 = vld [vmem:[%s6793_s29 + $0x2d0] sm:$0xff] }
  0xc0   : > { %5233 = vmatprep.mubr.msk.f32.mxu1 %vm399_vm0, %v253_v9  ;;  %5898 = vmatprep.subr.msk.bf16.mxu0 %vm6801_vm1, %v5896_v8  ;;  %v280_v9 = vld [vmem:[%s6785_s17 + $0x248] sm:$0xff] }
  0xc1   : > { %5206 = vmatmul.mubr.msk.f32.gmra.mrb[22].mxu0 %vm399_vm0, %v246_v11  ;;  %5922 = vmatprep.subr.msk.bf16.mxu1 %vm6801_vm1, %v5920_v10  ;;  %v5986_v11 = vpack.c.bf16 %v386_v5, %v385_v4 }
  0xc2   : > { %5234 = vmatmul.mubr.msk.f32.gmra.mrb[22].mxu1 %vm399_vm0, %v254_v12  ;;  %5252 = vmatprep.mubr.msk.f32.mxu0 %vm399_vm0, %v255_v13  ;;  %v281_v12 = vld [vmem:[%s6785_s17 + $0x250] sm:$0xff] }
  0xc3   : > { %5280 = vmatprep.mubr.msk.f32.mxu1 %vm399_vm0, %v263_v16  ;;  %v275_v16 = vld [vmem:[%s6785_s17 + $0x220] sm:$0xff] }
  0xc6   : > { %5901 = vmatpush3.bf16.xpose.msk.msra.mxu0 %vm6801_vm1, %v5896_v8  ;;  %v394_v8 = vld [vmem:[%s6793_s29 + $0x2d8] sm:$0xff] }
  0xc7   : > { %5925 = vmatpush3.bf16.xpose.msk.msra.mxu1 %vm6801_vm1, %v5920_v10  ;;  %5904 = vmatprep.subr.msk.bf16.mxu0 %vm6801_vm1, %v5902_v19  ;;  %v273_v10 = vld [vmem:[%s6785_s17 + $0x210] sm:$0xff]  ;;  %v6010_v13 = vpack.c.bf16 %v394_v8, %v393_v7 }
  0xc8   : > { %5928 = vmatprep.subr.msk.bf16.mxu1 %vm6801_vm1, %v5926_v20 }
  0xce   : > { %5907 = vmatpush3.bf16.xpose.msk.msra.mxu0 %vm6801_vm1, %v5902_v19  ;;  %v388_v19 = vld [vmem:[%s6793_s29 + $0x2a8] sm:$0xff] }
  0xcf   : > { %5931 = vmatpush3.bf16.xpose.msk.msra.mxu1 %vm6801_vm1, %v5926_v20  ;;  %5934 = vmatprep.subr.msk.bf16.mxu0 %vm6801_vm1, %v5932_v25  ;;  %v276_v20 = vld [vmem:[%s6785_s17 + $0x228] sm:$0xff] }
  0xd0   : > { %5958 = vmatprep.subr.msk.bf16.mxu1 %vm6801_vm1, %v5956_v26 }
  0xd5   : > { %5253 = vmatmul.mubr.msk.f32.vlgmr.msra.gmra.mrb[24].mxu0 %vm399_vm0, %v256_v29  ;;  %v286_v29 = vld [vmem:[%s6785_s17 + $0x278] sm:$0xff] }
  0xd6   : > { %5281 = vmatmul.mubr.msk.f32.vlgmr.msra.gmra.mrb[24].mxu1 %vm399_vm0, %v264_v32  ;;  %5937 = vmatpush3.bf16.xpose.msk.msra.mxu0 %vm6801_vm1, %v5932_v25  ;;  %v5992_v25 = vpack.c.bf16 %v388_v19, %v387_v18  ;;  %v390_v32 = vld [vmem:[%s6793_s29 + $0x2b8] sm:$0xff] }
  0xd7   : > { %5961 = vmatpush3.bf16.xpose.msk.msra.mxu1 %vm6801_vm1, %v5956_v26  ;;  %5255 = vmatprep.mubr.msk.f32.mxu0 %vm399_vm0, %v257_v33  ;;  %v285_v26 = vld [vmem:[%s6785_s17 + $0x270] sm:$0xff]  ;;  %v295_v33 = vld [vmem:[%s6785_s17 + $0x2c0] sm:$0xff] }
  0xd8   : > { %5283 = vmatprep.mubr.msk.f32.mxu1 %vm399_vm0, %v265_v35  ;;  %5940 = vmatprep.subr.msk.bf16.mxu0 %vm6801_vm1, %v5938_v34  ;;  %v398_v35 = vld [vmem:[%s6793_s29 + $0x2f8] sm:$0xff] }
  0xd9   : > { %5256 = vmatmul.mubr.msk.f32.gmra.mrb[26].mxu0 %vm399_vm0, %v258_v37  ;;  %5964 = vmatprep.subr.msk.bf16.mxu1 %vm6801_vm1, %v5962_v36 }
  0xda   : > { %5284 = vmatmul.mubr.msk.f32.gmra.mrb[26].mxu1 %vm399_vm0, %v266_v38  ;;  %5258 = vmatprep.mubr.msk.f32.mxu0 %vm399_vm0, %v259_v39  ;;  %v288_v38 = vld [vmem:[%s6785_s17 + $0x288] sm:$0xff] }
  0xdb   : > { %5286 = vmatprep.mubr.msk.f32.mxu1 %vm399_vm0, %v267_v40  ;;  %v296_v39 = vld [vmem:[%s6785_s17 + $0x2c8] sm:$0xff]  ;;  %v289_v40 = vld [vmem:[%s6785_s17 + $0x290] sm:$0xff] }
  0xdd   : > { %5259 = vmatmul.mubr.msk.f32.gmra.mrb[28].mxu0 %vm399_vm0, %v260_v43  ;;  %v291_v43 = vld [vmem:[%s6785_s17 + $0x2a0] sm:$0xff] }
  0xde   : > { %5287 = vmatmul.mubr.msk.f32.gmra.mrb[28].mxu1 %vm399_vm0, %v268_v46  ;;  %5943 = vmatpush3.bf16.xpose.msk.msra.mxu0 %vm6801_vm1, %v5938_v34  ;;  %v397_v34 = vld [vmem:[%s6793_s29 + $0x2f0] sm:$0xff]  ;;  %v300_v46 = vld [vmem:[%s6785_s17 + $0x2e8] sm:$0xff] }
  0xdf   : > { %5967 = vmatpush3.bf16.xpose.msk.msra.mxu1 %vm6801_vm1, %v5962_v36  ;;  %5261 = vmatprep.mubr.msk.f32.mxu0 %vm399_vm0, %v261_v47  ;;  %v5998_v36 = vpack.c.bf16 %v390_v32, %v389_v31  ;;  %v6022_v37 = vpack.c.bf16 %v398_v35, %v397_v34  ;;  %v293_v47 = vld [vmem:[%s6785_s17 + $0x2b0] sm:$0xff] }
  0xe0   : > { %5289 = vmatprep.mubr.msk.f32.mxu1 %vm399_vm0, %v269_v49  ;;  %5946 = vmatprep.subr.msk.bf16.mxu0 %vm6801_vm1, %v5944_v48  ;;  %v294_v49 = vld [vmem:[%s6785_s17 + $0x2b8] sm:$0xff] }
  0xe1   : > { %5262 = vmatmul.mubr.msk.f32.gmra.mrb[30].mxu0 %vm399_vm0, %v262_v51  ;;  %5970 = vmatprep.subr.msk.bf16.mxu1 %vm6801_vm1, %v5968_v50 }
  0xe2   : > { %5290 = vmatmul.mubr.msk.f32.gmra.mrb[30].mxu1 %vm399_vm0, %v270_v52  ;;  %5308 = vmatprep.mubr.msk.f32.mxu0 %vm399_vm0, %v271_v53 }
  0xe3   : > { %5336 = vmatprep.mubr.msk.f32.mxu1 %vm399_vm0, %v279_v56 }
  0xe6   : > { %5949 = vmatpush3.bf16.xpose.msk.msra.mxu0 %vm6801_vm1, %v5944_v48  ;;  %v301_v48 = vld [vmem:[%s6785_s17 + $0x2f0] sm:$0xff] }
  0xe7   : > { %5973 = vmatpush3.bf16.xpose.msk.msra.mxu1 %vm6801_vm1, %v5968_v50  ;;  %5952 = vmatprep.subr.msk.bf16.mxu0 %vm6801_vm1, %v5950_v59  ;;  %v302_v50 = vld [vmem:[%s6785_s17 + $0x2f8] sm:$0xff] }
  0xe8   : > { %5976 = vmatprep.subr.msk.bf16.mxu1 %vm6801_vm1, %v5974_v60 }
  0xee   : > { %5955 = vmatpush3.bf16.xpose.msk.msra.mxu0 %vm6801_vm1, %v5950_v59 }
  0xef   : > { %5979 = vmatpush3.bf16.xpose.msk.msra.mxu1 %vm6801_vm1, %v5974_v60  ;;  %5982 = vmatprep.subr.msk.bf16.mxu0 %vm6801_vm1, %v5980_v2 }
  0xf0   : > { %6006 = vmatprep.subr.msk.bf16.mxu1 %vm6801_vm1, %v6004_v3 }
  0xf5   : > { %5309 = vmatmul.mubr.msk.f32.vlgmr.msra.gmra.mrb[32].mxu0 %vm399_vm0, %v272_v6 }
  0xf6   : > { %5337 = vmatmul.mubr.msk.f32.vlgmr.msra.gmra.mrb[32].mxu1 %vm399_vm0, %v280_v9  ;;  %5985 = vmatpush3.bf16.xpose.msk.msra.mxu0 %vm6801_vm1, %v5980_v2 }
  0xf7   : > { %6009 = vmatpush3.bf16.xpose.msk.msra.mxu1 %vm6801_vm1, %v6004_v3  ;;  %5311 = vmatprep.mubr.msk.f32.mxu0 %vm399_vm0, %v273_v10 }
  0xf8   : > { %5339 = vmatprep.mubr.msk.f32.mxu1 %vm399_vm0, %v281_v12  ;;  %5988 = vmatprep.subr.msk.bf16.mxu0 %vm6801_vm1, %v5986_v11 }
  0xf9   : > { %5312 = vmatmul.mubr.msk.f32.gmra.mrb[34].mxu0 %vm399_vm0, %v274_v14  ;;  %6012 = vmatprep.subr.msk.bf16.mxu1 %vm6801_vm1, %v6010_v13 }
  0xfa   : > { %5340 = vmatmul.mubr.msk.f32.gmra.mrb[34].mxu1 %vm399_vm0, %v282_v15  ;;  %5314 = vmatprep.mubr.msk.f32.mxu0 %vm399_vm0, %v275_v16 }
  0xfb   : > { %5342 = vmatprep.mubr.msk.f32.mxu1 %vm399_vm0, %v283_v17 }
  0xfd   : > { %5315 = vmatmul.mubr.msk.f32.gmra.mrb[36].mxu0 %vm399_vm0, %v276_v20 }
  0xfe   : > { %5343 = vmatmul.mubr.msk.f32.gmra.mrb[36].mxu1 %vm399_vm0, %v284_v23  ;;  %5991 = vmatpush3.bf16.xpose.msk.msra.mxu0 %vm6801_vm1, %v5986_v11 }
  0xff   : > { %6015 = vmatpush3.bf16.xpose.msk.msra.mxu1 %vm6801_vm1, %v6010_v13  ;;  %5317 = vmatprep.mubr.msk.f32.mxu0 %vm399_vm0, %v277_v24 }
 0x100   : > { %5345 = vmatprep.mubr.msk.f32.mxu1 %vm399_vm0, %v285_v26  ;;  %5994 = vmatprep.subr.msk.bf16.mxu0 %vm6801_vm1, %v5992_v25 }
 0x101   : > { %5318 = vmatmul.mubr.msk.f32.gmra.mrb[38].mxu0 %vm399_vm0, %v278_v28  ;;  %6018 = vmatprep.subr.msk.bf16.mxu1 %vm6801_vm1, %v6016_v27 }
 0x102   : > { %5346 = vmatmul.mubr.msk.f32.gmra.mrb[38].mxu1 %vm399_vm0, %v286_v29  ;;  %5364 = vmatprep.mubr.msk.f32.mxu0 %vm399_vm0, %v287_v30 }
 0x103   : > { %5392 = vmatprep.mubr.msk.f32.mxu1 %vm399_vm0, %v295_v33 }
 0x106   : > { %5997 = vmatpush3.bf16.xpose.msk.msra.mxu0 %vm6801_vm1, %v5992_v25 }
 0x107   : > { %6021 = vmatpush3.bf16.xpose.msk.msra.mxu1 %vm6801_vm1, %v6016_v27  ;;  %6000 = vmatprep.subr.msk.bf16.mxu0 %vm6801_vm1, %v5998_v36 }
 0x108   : > { %6024 = vmatprep.subr.msk.bf16.mxu1 %vm6801_vm1, %v6022_v37 }
 0x10e   : > { %6003 = vmatpush3.bf16.xpose.msk.msra.mxu0 %vm6801_vm1, %v5998_v36 }
 0x10f   : > { %6027 = vmatpush3.bf16.xpose.msk.msra.mxu1 %vm6801_vm1, %v6022_v37 }
 0x115   : > { %5365 = vmatmul.mubr.msk.f32.vlgmr.msra.gmra.mrb[40].mxu0 %vm399_vm0, %v288_v38 }
 0x116   : > { %5393 = vmatmul.mubr.msk.f32.vlgmr.msra.gmra.mrb[40].mxu1 %vm399_vm0, %v296_v39  ;;  %5367 = vmatprep.mubr.msk.f32.mxu0 %vm399_vm0, %v289_v40 }
 0x117   : > { %5395 = vmatprep.mubr.msk.f32.mxu1 %vm399_vm0, %v297_v41 }
 0x119   : > { %5368 = vmatmul.mubr.msk.f32.gmra.mrb[42].mxu0 %vm399_vm0, %v290_v42 }
 0x11a   : > { %5396 = vmatmul.mubr.msk.f32.gmra.mrb[42].mxu1 %vm399_vm0, %v298_v0  ;;  %5370 = vmatprep.mubr.msk.f32.mxu0 %vm399_vm0, %v291_v43 }
 0x11b   : > { %5398 = vmatprep.mubr.msk.f32.mxu1 %vm399_vm0, %v299_v44 }
 0x11d   : > { %5371 = vmatmul.mubr.msk.f32.gmra.mrb[44].mxu0 %vm399_vm0, %v292_v45 }
 0x11e   : > { %5399 = vmatmul.mubr.msk.f32.gmra.mrb[44].mxu1 %vm399_vm0, %v300_v46  ;;  %5373 = vmatprep.mubr.msk.f32.mxu0 %vm399_vm0, %v293_v47 }
 0x11f   : > { %5401 = vmatprep.mubr.msk.f32.mxu1 %vm399_vm0, %v301_v48 }
 0x121   : > { %5374 = vmatmul.mubr.msk.f32.gmra.mrb[46].mxu0 %vm399_vm0, %v294_v49 }
 0x122   : > { %5402 = vmatmul.mubr.msk.f32.gmra.mrb[46].mxu1 %vm399_vm0, %v302_v50 }
 0x148   : > { %v7285_v51 = vpop.f32.mrb[0].mxu0 }
 0x149   : > { %v2333_v52 = vmul.f32 0.70710677, %v7285_v51  ;;  %v7288_v53 = vpop.f32.mrb[0].mxu1  ;;  %v514_v54 = vpop.f32.mrb[1].mxu0 }
 0x14a   : > { %v2341_v55 = vmul.f32 0.70710677, %v7288_v53  ;;  %v2236_v56 = vmul.f32 0.5, %v514_v54  ;;  %v2332_v57 = vmul.f32 0.70710677, %v514_v54  ;;  %v667_v58 = vpop.f32.mrb[1].mxu1 }
 0x14b   : > { %6278 = verf.f32 %v2333_v52  ;;  %v2244_v59 = vmul.f32 0.5, %v667_v58  ;;  %v2340_v60 = vmul.f32 0.70710677, %v667_v58 }
 0x14c   : > { %6280 = verf.f32 %v2341_v55  ;;  %v7291_v61 = vpop.f32.mrb[2].mxu0  ;;  %5420 = vmatprep.mubr.msk.f32.mxu0 %vm399_vm0, %v2236_v56 }
 0x14d   : > { %6282 = verf.f32 %v2332_v57  ;;  %v2335_v62 = vmul.f32 0.70710677, %v7291_v61  ;;  %v7295_v63 = vpop.f32.mrb[2].mxu1  ;;  %v7297_v1 = vpop.f32.mrb[3].mxu0  ;;  %5448 = vmatprep.mubr.msk.f32.mxu1 %vm399_vm0, %v2244_v59 }
 0x14e   : > { %6284 = verf.f32 %v2340_v60  ;;  %v2343_v2 = vmul.f32 0.70710677, %v7295_v63  ;;  %v7301_v3 = vpop.f32.mrb[3].mxu1  ;;  %v2334_v4 = vmul.f32 0.70710677, %v7297_v1 }
 0x14f   : > { %6286 = verf.f32 %v2335_v62  ;;  %v2342_v5 = vmul.f32 0.70710677, %v7301_v3 }
 0x150   : > { %6288 = verf.f32 %v2343_v2  ;;  %v7305_v6 = vpop.f32.mrb[4].mxu0 }
 0x151   : > { %6290 = verf.f32 %v2334_v4  ;;  %v2337_v7 = vmul.f32 0.70710677, %v7305_v6  ;;  %v7308_v8 = vpop.f32.mrb[4].mxu1  ;;  %v7310_v9 = vpop.f32.mrb[5].mxu0 }
 0x152   : > { %6292 = verf.f32 %v2342_v5  ;;  %v2345_v10 = vmul.f32 0.70710677, %v7308_v8  ;;  %v7313_v11 = vpop.f32.mrb[5].mxu1  ;;  %v2336_v12 = vmul.f32 0.70710677, %v7310_v9 }
 0x153   : > { %6294 = verf.f32 %v2337_v7  ;;  %v2344_v13 = vmul.f32 0.70710677, %v7313_v11 }
 0x154   : > { %6296 = verf.f32 %v2345_v10  ;;  %v7317_v14 = vpop.f32.mrb[6].mxu0 }
 0x155   : > { %v6279_v15 = vpop.eup %6278  ;;  %6298 = verf.f32 %v2336_v12  ;;  %v2339_v16 = vmul.f32 0.70710677, %v7317_v14  ;;  %v7320_v17 = vpop.f32.mrb[6].mxu1  ;;  %v2237_v12 = vmul.f32 0.5, %v7285_v51 }
 0x156   : > { %v7322_v18 = vpop.f32.mrb[7].mxu0  ;;  %v6281_v19 = vpop.eup %6280  ;;  %v2525_v20 = vadd.f32 1.0, %v6279_v15  ;;  %6300 = verf.f32 %v2344_v13  ;;  %v2347_v21 = vmul.f32 0.70710677, %v7320_v17 }
 0x157   : > { %v7325_v22 = vpop.f32.mrb[7].mxu1  ;;  %v6283_v23 = vpop.eup %6282  ;;  %v2533_v24 = vadd.f32 1.0, %v6281_v19  ;;  %6302 = verf.f32 %v2339_v16  ;;  %v2338_v25 = vmul.f32 0.70710677, %v7322_v18  ;;  %v2245_v16 = vmul.f32 0.5, %v7288_v53 }
 0x158   : > { %v6285_v26 = vpop.eup %6284  ;;  %v2524_v27 = vadd.f32 1.0, %v6283_v23  ;;  %6304 = verf.f32 %v2347_v21  ;;  %v2346_v28 = vmul.f32 0.70710677, %v7325_v22  ;;  %v2238_v19 = vmul.f32 0.5, %v7297_v1 }
 0x159   : > { %v6287_v29 = vpop.eup %6286  ;;  %v2532_v30 = vadd.f32 1.0, %v6285_v26  ;;  %6306 = verf.f32 %v2338_v25  ;;  %v2246_v21 = vmul.f32 0.5, %v7301_v3  ;;  %v2239_v3 = vmul.f32 0.5, %v7291_v61 }
 0x15a   : > { %v6289_v31 = vpop.eup %6288  ;;  %v2527_v32 = vadd.f32 1.0, %v6287_v29  ;;  %6308 = verf.f32 %v2346_v28  ;;  %v6028_v33 = vpack.c.bf16 %v2525_v20, %v2524_v27  ;;  %v2247_v25 = vmul.f32 0.5, %v7295_v63 }
 0x15b   : > { %v6291_v34 = vpop.eup %6290  ;;  %v2535_v35 = vadd.f32 1.0, %v6289_v31  ;;  %v6044_v36 = vpack.c.bf16 %v2533_v24, %v2532_v30  ;;  %v2240_v28 = vmul.f32 0.5, %v7310_v9  ;;  %v2248_v31 = vmul.f32 0.5, %v7313_v11 }
 0x15c   : > { %v6293_v37 = vpop.eup %6292  ;;  %v2526_v38 = vadd.f32 1.0, %v6291_v34  ;;  %6029 = vmatprep.subr.bf16.mxu0 %v6028_v33  ;;  %v2249_v11 = vmul.f32 0.5, %v7308_v8 }
 0x15d   : > { %v6295_v39 = vpop.eup %6294  ;;  %v2534_v40 = vadd.f32 1.0, %v6293_v37  ;;  %6045 = vmatprep.subr.bf16.mxu1 %v6044_v36  ;;  %6031 = vmatpush3.bf16.msra.mxu0 %v6028_v33  ;;  %v2241_v33 = vmul.f32 0.5, %v7305_v6 }
 0x15e   : > { %v6297_v41 = vpop.eup %6296  ;;  %v2529_v42 = vadd.f32 1.0, %v6295_v39  ;;  %6047 = vmatpush3.bf16.msra.mxu1 %v6044_v36  ;;  %v6032_v0 = vpack.c.bf16 %v2527_v32, %v2526_v38  ;;  %v2242_v36 = vmul.f32 0.5, %v7322_v18  ;;  %v2250_v39 = vmul.f32 0.5, %v7325_v22 }
 0x15f   : > { %v6299_v43 = vpop.eup %6298  ;;  %v2537_v44 = vadd.f32 1.0, %v6297_v41  ;;  %v6048_v45 = vpack.c.bf16 %v2535_v35, %v2534_v40  ;;  %v2243_v40 = vmul.f32 0.5, %v7317_v14 }
 0x160   : > { %v6301_v46 = vpop.eup %6300  ;;  %v2528_v47 = vadd.f32 1.0, %v6299_v43  ;;  %6033 = vmatprep.subr.bf16.mxu0 %v6032_v0 }
 0x161   : > { %v6303_v48 = vpop.eup %6302  ;;  %v2536_v49 = vadd.f32 1.0, %v6301_v46  ;;  %6049 = vmatprep.subr.bf16.mxu1 %v6048_v45  ;;  %6035 = vmatpush3.bf16.msra.mxu0 %v6032_v0  ;;  %v2251_v0 = vmul.f32 0.5, %v7320_v17 }
 0x162   : > { %v6305_v50 = vpop.eup %6304  ;;  %v2531_v52 = vadd.f32 1.0, %v6303_v48  ;;  %6051 = vmatpush3.bf16.msra.mxu1 %v6048_v45  ;;  %v6036_v54 = vpack.c.bf16 %v2529_v42, %v2528_v47 }
 0x163   : > { %v6307_v55 = vpop.eup %6306  ;;  %v2539_v56 = vadd.f32 1.0, %v6305_v50  ;;  %v6052_v57 = vpack.c.bf16 %v2537_v44, %v2536_v49 }
 0x164   : > { %v6309_v58 = vpop.eup %6308  ;;  %v2530_v59 = vadd.f32 1.0, %v6307_v55  ;;  %6037 = vmatprep.subr.bf16.mxu0 %v6036_v54 }
 0x165   : > { %v2538_v60 = vadd.f32 1.0, %v6309_v58  ;;  %6053 = vmatprep.subr.bf16.mxu1 %v6052_v57  ;;  %6039 = vmatpush3.bf16.msra.mxu0 %v6036_v54 }
 0x166   : > { %6055 = vmatpush3.bf16.msra.mxu1 %v6052_v57  ;;  %v6040_v62 = vpack.c.bf16 %v2531_v52, %v2530_v59 }
 0x167   : > { %v6056_v2 = vpack.c.bf16 %v2539_v56, %v2538_v60 }
 0x168   : > { %6041 = vmatprep.subr.bf16.mxu0 %v6040_v62  ;;  %v7329_v4 = vpop.f32.mrb[8].mxu0 }
 0x169   : > { %6057 = vmatprep.subr.bf16.mxu1 %v6056_v2  ;;  %v2349_v5 = vmul.f32 0.70710677, %v7329_v4  ;;  %v7332_v7 = vpop.f32.mrb[8].mxu1  ;;  %6043 = vmatpush3.bf16.msra.mxu0 %v6040_v62  ;;  %v7334_v10 = vpop.f32.mrb[9].mxu0 }
 0x16a   : > { %v2357_v13 = vmul.f32 0.70710677, %v7332_v7  ;;  %6059 = vmatpush3.bf16.msra.mxu1 %v6056_v2  ;;  %v2348_v15 = vmul.f32 0.70710677, %v7334_v10  ;;  %v7341_v20 = vpop.f32.mrb[9].mxu1  ;;  %v2252_v47 = vmul.f32 0.5, %v7334_v10 }
 0x16b   : > { %6310 = verf.f32 %v2349_v5  ;;  %v2356_v23 = vmul.f32 0.70710677, %v7341_v20  ;;  %v2260_v52 = vmul.f32 0.5, %v7341_v20 }
 0x16c   : > { %6312 = verf.f32 %v2357_v13  ;;  %5421 = vmatmul.mubr.msk.f32.vlgmr.msra.gmra.mrb[48].mxu0 %vm399_vm0, %v2237_v12  ;;  %v7346_v51 = vpop.f32.mrb[10].mxu0 }
 0x16d   : > { %6314 = verf.f32 %v2348_v15  ;;  %5449 = vmatmul.mubr.msk.f32.vlgmr.msra.gmra.mrb[48].mxu1 %vm399_vm0, %v2245_v16  ;;  %v2351_v24 = vmul.f32 0.70710677, %v7346_v51  ;;  %v7350_v53 = vpop.f32.mrb[10].mxu1  ;;  %5423 = vmatprep.mubr.msk.f32.mxu0 %vm399_vm0, %v2238_v19  ;;  %v7353_v1 = vpop.f32.mrb[11].mxu0 }
 0x16e   : > { %6316 = verf.f32 %v2356_v23  ;;  %v2359_v26 = vmul.f32 0.70710677, %v7350_v53  ;;  %5451 = vmatprep.mubr.msk.f32.mxu1 %vm399_vm0, %v2246_v21  ;;  %v7359_v27 = vpop.f32.mrb[11].mxu1  ;;  %v2350_v29 = vmul.f32 0.70710677, %v7353_v1 }
 0x16f   : > { %6318 = verf.f32 %v2351_v24  ;;  %v2358_v30 = vmul.f32 0.70710677, %v7359_v27 }
 0x170   : > { %6320 = verf.f32 %v2359_v26  ;;  %5424 = vmatmul.mubr.msk.f32.gmra.mrb[50].mxu0 %vm399_vm0, %v2239_v3  ;;  %v7366_v61 = vpop.f32.mrb[12].mxu0 }
 0x171   : > { %6322 = verf.f32 %v2350_v29  ;;  %5452 = vmatmul.mubr.msk.f32.gmra.mrb[50].mxu1 %vm399_vm0, %v2247_v25  ;;  %v2353_v63 = vmul.f32 0.70710677, %v7366_v61  ;;  %v7370_v32 = vpop.f32.mrb[12].mxu1  ;;  %5426 = vmatprep.mubr.msk.f32.mxu0 %vm399_vm0, %v2240_v28  ;;  %v7373_v9 = vpop.f32.mrb[13].mxu0 }
 0x172   : > { %6324 = verf.f32 %v2358_v30  ;;  %v2361_v34 = vmul.f32 0.70710677, %v7370_v32  ;;  %5454 = vmatprep.mubr.msk.f32.mxu1 %vm399_vm0, %v2248_v31  ;;  %v7379_v35 = vpop.f32.mrb[13].mxu1  ;;  %v2352_v37 = vmul.f32 0.70710677, %v7373_v9 }
 0x173   : > { %6326 = verf.f32 %v2353_v63  ;;  %v2360_v38 = vmul.f32 0.70710677, %v7379_v35 }
 0x174   : > { %6328 = verf.f32 %v2361_v34  ;;  %5427 = vmatmul.mubr.msk.f32.gmra.mrb[52].mxu0 %vm399_vm0, %v2241_v33  ;;  %v7386_v6 = vpop.f32.mrb[14].mxu0 }
 0x175   : > { %v6311_v8 = vpop.eup %6310  ;;  %6330 = verf.f32 %v2352_v37  ;;  %5455 = vmatmul.mubr.msk.f32.gmra.mrb[52].mxu1 %vm399_vm0, %v2249_v11  ;;  %v2355_v18 = vmul.f32 0.70710677, %v7386_v6  ;;  %v7391_v41 = vpop.f32.mrb[14].mxu1  ;;  %5429 = vmatprep.mubr.msk.f32.mxu0 %vm399_vm0, %v2242_v36 }
 0x176   : > { %v7394_v42 = vpop.f32.mrb[15].mxu0  ;;  %v6313_v22 = vpop.eup %6312  ;;  %v2541_v43 = vadd.f32 1.0, %v6311_v8  ;;  %6332 = verf.f32 %v2360_v38  ;;  %v2363_v44 = vmul.f32 0.70710677, %v7391_v41  ;;  %5457 = vmatprep.mubr.msk.f32.mxu1 %vm399_vm0, %v2250_v39 }
 0x177   : > { %v7399_v14 = vpop.f32.mrb[15].mxu1  ;;  %v6315_v45 = vpop.eup %6314  ;;  %v2549_v46 = vadd.f32 1.0, %v6313_v22  ;;  %6334 = verf.f32 %v2355_v18  ;;  %v2354_v48 = vmul.f32 0.70710677, %v7394_v42  ;;  %v2253_v18 = vmul.f32 0.5, %v7329_v4 }
 0x178   : > { %v6317_v49 = vpop.eup %6316  ;;  %v2540_v50 = vadd.f32 1.0, %v6315_v45  ;;  %6336 = verf.f32 %v2363_v44  ;;  %v2362_v17 = vmul.f32 0.70710677, %v7399_v14  ;;  %5430 = vmatmul.mubr.msk.f32.gmra.mrb[54].mxu0 %vm399_vm0, %v2243_v40  ;;  %v2254_v44 = vmul.f32 0.5, %v7353_v1 }
 0x179   : > { %v6319_v54 = vpop.eup %6318  ;;  %v2548_v55 = vadd.f32 1.0, %v6317_v49  ;;  %6338 = verf.f32 %v2354_v48  ;;  %5458 = vmatmul.mubr.msk.f32.gmra.mrb[54].mxu1 %vm399_vm0, %v2251_v0  ;;  %5476 = vmatprep.mubr.msk.f32.mxu0 %vm399_vm0, %v2252_v47  ;;  %v2263_v49 = vmul.f32 0.5, %v7350_v53 }
 0x17a   : > { %v6321_v56 = vpop.eup %6320  ;;  %v2543_v57 = vadd.f32 1.0, %v6319_v54  ;;  %6340 = verf.f32 %v2362_v17  ;;  %5504 = vmatprep.mubr.msk.f32.mxu1 %vm399_vm0, %v2260_v52  ;;  %v6060_v58 = vpack.c.bf16 %v2541_v43, %v2540_v50  ;;  %v2261_v43 = vmul.f32 0.5, %v7332_v7 }
 0x17b   : > { %v6323_v59 = vpop.eup %6322  ;;  %v2551_v60 = vadd.f32 1.0, %v6321_v56  ;;  %v6076_v62 = vpack.c.bf16 %v2549_v46, %v2548_v55  ;;  %v2262_v46 = vmul.f32 0.5, %v7359_v27  ;;  %v2255_v27 = vmul.f32 0.5, %v7346_v51 }
 0x17c   : > { %v6325_v2 = vpop.eup %6324  ;;  %v2542_v5 = vadd.f32 1.0, %v6323_v59  ;;  %6061 = vmatprep.subr.bf16.mxu0 %v6060_v58  ;;  %v2256_v17 = vmul.f32 0.5, %v7373_v9  ;;  %v2264_v56 = vmul.f32 0.5, %v7379_v35  ;;  %v2265_v35 = vmul.f32 0.5, %v7370_v32 }
 0x17d   : > { %v6327_v10 = vpop.eup %6326  ;;  %v2550_v12 = vadd.f32 1.0, %v6325_v2  ;;  %6077 = vmatprep.subr.bf16.mxu1 %v6076_v62  ;;  %6063 = vmatpush3.bf16.msra.mxu0 %v6060_v58  ;;  %v2257_v58 = vmul.f32 0.5, %v7366_v61 }
 0x17e   : > { %v6329_v13 = vpop.eup %6328  ;;  %v2545_v15 = vadd.f32 1.0, %v6327_v10  ;;  %6079 = vmatpush3.bf16.msra.mxu1 %v6076_v62  ;;  %v6064_v16 = vpack.c.bf16 %v2543_v57, %v2542_v5  ;;  %v2258_v62 = vmul.f32 0.5, %v7394_v42  ;;  %v2266_v10 = vmul.f32 0.5, %v7399_v14 }
 0x17f   : > { %v6331_v19 = vpop.eup %6330  ;;  %v2553_v20 = vadd.f32 1.0, %v6329_v13  ;;  %v6080_v21 = vpack.c.bf16 %v2551_v60, %v2550_v12  ;;  %v2259_v12 = vmul.f32 0.5, %v7386_v6 }
 0x180   : > { %v6333_v23 = vpop.eup %6332  ;;  %v2544_v24 = vadd.f32 1.0, %v6331_v19  ;;  %6065 = vmatprep.subr.bf16.mxu0 %v6064_v16 }
 0x181   : > { %v6335_v3 = vpop.eup %6334  ;;  %v2552_v25 = vadd.f32 1.0, %v6333_v23  ;;  %6081 = vmatprep.subr.bf16.mxu1 %v6080_v21  ;;  %6067 = vmatpush3.bf16.msra.mxu0 %v6064_v16  ;;  %v2267_v16 = vmul.f32 0.5, %v7391_v41 }
 0x182   : > { %v6337_v26 = vpop.eup %6336  ;;  %v2547_v28 = vadd.f32 1.0, %v6335_v3  ;;  %6083 = vmatpush3.bf16.msra.mxu1 %v6080_v21  ;;  %v6068_v29 = vpack.c.bf16 %v2545_v15, %v2544_v24 }
 0x183   : > { %v6339_v30 = vpop.eup %6338  ;;  %v2555_v31 = vadd.f32 1.0, %v6337_v26  ;;  %v6084_v63 = vpack.c.bf16 %v2553_v20, %v2552_v25 }
 0x184   : > { %v6341_v33 = vpop.eup %6340  ;;  %v2546_v11 = vadd.f32 1.0, %v6339_v30  ;;  %6069 = vmatprep.subr.bf16.mxu0 %v6068_v29 }
 0x185   : > { %v2554_v34 = vadd.f32 1.0, %v6341_v33  ;;  %6085 = vmatprep.subr.bf16.mxu1 %v6084_v63  ;;  %6071 = vmatpush3.bf16.msra.mxu0 %v6068_v29 }
 0x186   : > { %6087 = vmatpush3.bf16.msra.mxu1 %v6084_v63  ;;  %v6072_v36 = vpack.c.bf16 %v2547_v28, %v2546_v11 }
 0x187   : > { %v6088_v37 = vpack.c.bf16 %v2555_v31, %v2554_v34 }
 0x188   : > { %6073 = vmatprep.subr.bf16.mxu0 %v6072_v36  ;;  %v7409_v38 = vpop.f32.mrb[16].mxu0 }
 0x189   : > { %6089 = vmatprep.subr.bf16.mxu1 %v6088_v37  ;;  %v2365_v39 = vmul.f32 0.70710677, %v7409_v38  ;;  %v7412_v8 = vpop.f32.mrb[16].mxu1  ;;  %6075 = vmatpush3.bf16.msra.mxu0 %v6072_v36  ;;  %v7414_v40 = vpop.f32.mrb[17].mxu0 }
 0x18a   : > { %v2373_v22 = vmul.f32 0.70710677, %v7412_v8  ;;  %6091 = vmatpush3.bf16.msra.mxu1 %v6088_v37  ;;  %v2364_v0 = vmul.f32 0.70710677, %v7414_v40  ;;  %v7421_v45 = vpop.f32.mrb[17].mxu1  ;;  %v2268_v24 = vmul.f32 0.5, %v7414_v40 }
 0x18b   : > { %6342 = verf.f32 %v2365_v39  ;;  %v2372_v47 = vmul.f32 0.70710677, %v7421_v45  ;;  %v2276_v28 = vmul.f32 0.5, %v7421_v45 }
 0x18c   : > { %6344 = verf.f32 %v2373_v22  ;;  %5477 = vmatmul.mubr.msk.f32.vlgmr.msra.gmra.mrb[56].mxu0 %vm399_vm0, %v2253_v18  ;;  %v7426_v4 = vpop.f32.mrb[18].mxu0 }
 0x18d   : > { %6346 = verf.f32 %v2364_v0  ;;  %5505 = vmatmul.mubr.msk.f32.vlgmr.msra.gmra.mrb[56].mxu1 %vm399_vm0, %v2261_v43  ;;  %v2367_v48 = vmul.f32 0.70710677, %v7426_v4  ;;  %v7430_v7 = vpop.f32.mrb[18].mxu1  ;;  %5479 = vmatprep.mubr.msk.f32.mxu0 %vm399_vm0, %v2254_v44  ;;  %v7433_v1 = vpop.f32.mrb[19].mxu0 }
 0x18e   : > { %6348 = verf.f32 %v2372_v47  ;;  %v2375_v50 = vmul.f32 0.70710677, %v7430_v7  ;;  %5507 = vmatprep.mubr.msk.f32.mxu1 %vm399_vm0, %v2262_v46  ;;  %v7439_v52 = vpop.f32.mrb[19].mxu1  ;;  %v2366_v54 = vmul.f32 0.70710677, %v7433_v1 }
 0x18f   : > { %6350 = verf.f32 %v2367_v48  ;;  %v2374_v55 = vmul.f32 0.70710677, %v7439_v52 }
 0x190   : > { %6352 = verf.f32 %v2375_v50  ;;  %5480 = vmatmul.mubr.msk.f32.gmra.mrb[58].mxu0 %vm399_vm0, %v2255_v27  ;;  %v7446_v51 = vpop.f32.mrb[20].mxu0 }
 0x191   : > { %6354 = verf.f32 %v2366_v54  ;;  %5508 = vmatmul.mubr.msk.f32.gmra.mrb[58].mxu1 %vm399_vm0, %v2263_v49  ;;  %v2369_v53 = vmul.f32 0.70710677, %v7446_v51  ;;  %v7450_v57 = vpop.f32.mrb[20].mxu1  ;;  %5482 = vmatprep.mubr.msk.f32.mxu0 %vm399_vm0, %v2256_v17  ;;  %v7453_v9 = vpop.f32.mrb[21].mxu0 }
 0x192   : > { %6356 = verf.f32 %v2374_v55  ;;  %v2377_v59 = vmul.f32 0.70710677, %v7450_v57  ;;  %5510 = vmatprep.mubr.msk.f32.mxu1 %vm399_vm0, %v2264_v56  ;;  %v7459_v60 = vpop.f32.mrb[21].mxu1  ;;  %v2368_v2 = vmul.f32 0.70710677, %v7453_v9 }
 0x193   : > { %6358 = verf.f32 %v2369_v53  ;;  %v2376_v5 = vmul.f32 0.70710677, %v7459_v60 }
 0x194   : > { %6360 = verf.f32 %v2377_v59  ;;  %5483 = vmatmul.mubr.msk.f32.gmra.mrb[60].mxu0 %vm399_vm0, %v2257_v58  ;;  %v7466_v61 = vpop.f32.mrb[22].mxu0 }
 0x195   : > { %v6343_v32 = vpop.eup %6342  ;;  %6362 = verf.f32 %v2368_v2  ;;  %5511 = vmatmul.mubr.msk.f32.gmra.mrb[60].mxu1 %vm399_vm0, %v2265_v35  ;;  %v2371_v42 = vmul.f32 0.70710677, %v7466_v61  ;;  %v7471_v13 = vpop.f32.mrb[22].mxu1  ;;  %5485 = vmatprep.mubr.msk.f32.mxu0 %vm399_vm0, %v2258_v62 }
 0x196   : > { %v7474_v15 = vpop.f32.mrb[23].mxu0  ;;  %v6345_v14 = vpop.eup %6344  ;;  %v2557_v19 = vadd.f32 1.0, %v6343_v32  ;;  %6364 = verf.f32 %v2376_v5  ;;  %v2379_v20 = vmul.f32 0.70710677, %v7471_v13  ;;  %5513 = vmatprep.mubr.msk.f32.mxu1 %vm399_vm0, %v2266_v10 }
 0x197   : > { %v7479_v6 = vpop.f32.mrb[23].mxu1  ;;  %v6347_v21 = vpop.eup %6346  ;;  %v2565_v23 = vadd.f32 1.0, %v6345_v14  ;;  %6366 = verf.f32 %v2371_v42  ;;  %v2370_v3 = vmul.f32 0.70710677, %v7474_v15  ;;  %v2269_v42 = vmul.f32 0.5, %v7409_v38 }
 0x198   : > { %v6349_v25 = vpop.eup %6348  ;;  %v2556_v26 = vadd.f32 1.0, %v6347_v21  ;;  %6368 = verf.f32 %v2379_v20  ;;  %v2378_v41 = vmul.f32 0.70710677, %v7479_v6  ;;  %5486 = vmatmul.mubr.msk.f32.gmra.mrb[62].mxu0 %vm399_vm0, %v2259_v12  ;;  %v2270_v20 = vmul.f32 0.5, %v7433_v1 }
 0x199   : > { %v6351_v29 = vpop.eup %6350  ;;  %v2564_v30 = vadd.f32 1.0, %v6349_v25  ;;  %6370 = verf.f32 %v2370_v3  ;;  %5514 = vmatmul.mubr.msk.f32.gmra.mrb[62].mxu1 %vm399_vm0, %v2267_v16  ;;  %5532 = vmatprep.mubr.msk.f32.mxu0 %vm399_vm0, %v2268_v24  ;;  %v2279_v25 = vmul.f32 0.5, %v7430_v7 }
 0x19a   : > { %v6353_v31 = vpop.eup %6352  ;;  %v2559_v63 = vadd.f32 1.0, %v6351_v29  ;;  %6372 = verf.f32 %v2378_v41  ;;  %5560 = vmatprep.mubr.msk.f32.mxu1 %vm399_vm0, %v2276_v28  ;;  %v6092_v33 = vpack.c.bf16 %v2557_v19, %v2556_v26  ;;  %v2277_v19 = vmul.f32 0.5, %v7412_v8 }
 0x19b   : > { %v6355_v11 = vpop.eup %6354  ;;  %v2567_v34 = vadd.f32 1.0, %v6353_v31  ;;  %v6108_v36 = vpack.c.bf16 %v2565_v23, %v2564_v30  ;;  %v2278_v23 = vmul.f32 0.5, %v7439_v52  ;;  %v2271_v52 = vmul.f32 0.5, %v7426_v4 }
 0x19c   : > { %v6357_v37 = vpop.eup %6356  ;;  %v2558_v39 = vadd.f32 1.0, %v6355_v11  ;;  %6093 = vmatprep.subr.bf16.mxu0 %v6092_v33  ;;  %v2272_v41 = vmul.f32 0.5, %v7453_v9  ;;  %v2280_v31 = vmul.f32 0.5, %v7459_v60  ;;  %v2281_v60 = vmul.f32 0.5, %v7450_v57 }
 0x19d   : > { %v6359_v40 = vpop.eup %6358  ;;  %v2566_v18 = vadd.f32 1.0, %v6357_v37  ;;  %6109 = vmatprep.subr.bf16.mxu1 %v6108_v36  ;;  %6095 = vmatpush3.bf16.msra.mxu0 %v6092_v33  ;;  %v2273_v33 = vmul.f32 0.5, %v7446_v51 }
 0x19e   : > { %v6361_v22 = vpop.eup %6360  ;;  %v2561_v0 = vadd.f32 1.0, %v6359_v40  ;;  %6111 = vmatpush3.bf16.msra.mxu1 %v6108_v36  ;;  %v6096_v43 = vpack.c.bf16 %v2559_v63, %v2558_v39  ;;  %v2274_v36 = vmul.f32 0.5, %v7474_v15  ;;  %v2282_v40 = vmul.f32 0.5, %v7479_v6 }
 0x19f   : > { %v6363_v44 = vpop.eup %6362  ;;  %v2569_v45 = vadd.f32 1.0, %v6361_v22  ;;  %v6112_v46 = vpack.c.bf16 %v2567_v34, %v2566_v18  ;;  %v2275_v18 = vmul.f32 0.5, %v7466_v61 }
 0x1a0   : > { %v6365_v47 = vpop.eup %6364  ;;  %v2560_v48 = vadd.f32 1.0, %v6363_v44  ;;  %6097 = vmatprep.subr.bf16.mxu0 %v6096_v43 }
 0x1a1   : > { %v6367_v27 = vpop.eup %6366  ;;  %v2568_v49 = vadd.f32 1.0, %v6365_v47  ;;  %6113 = vmatprep.subr.bf16.mxu1 %v6112_v46  ;;  %6099 = vmatpush3.bf16.msra.mxu0 %v6096_v43  ;;  %v2283_v43 = vmul.f32 0.5, %v7471_v13 }
 0x1a2   : > { %v6369_v50 = vpop.eup %6368  ;;  %v2563_v17 = vadd.f32 1.0, %v6367_v27  ;;  %6115 = vmatpush3.bf16.msra.mxu1 %v6112_v46  ;;  %v6100_v54 = vpack.c.bf16 %v2561_v0, %v2560_v48 }
 0x1a3   : > { %v6371_v55 = vpop.eup %6370  ;;  %v2571_v56 = vadd.f32 1.0, %v6369_v50  ;;  %v6116_v53 = vpack.c.bf16 %v2569_v45, %v2568_v49 }
 0x1a4   : > { %v6373_v58 = vpop.eup %6372  ;;  %v2562_v35 = vadd.f32 1.0, %v6371_v55  ;;  %6101 = vmatprep.subr.bf16.mxu0 %v6100_v54 }
 0x1a5   : > { %v2570_v59 = vadd.f32 1.0, %v6373_v58  ;;  %6117 = vmatprep.subr.bf16.mxu1 %v6116_v53  ;;  %6103 = vmatpush3.bf16.msra.mxu0 %v6100_v54 }
 0x1a6   : > { %6119 = vmatpush3.bf16.msra.mxu1 %v6116_v53  ;;  %v6104_v62 = vpack.c.bf16 %v2563_v17, %v2562_v35 }
 0x1a7   : > { %v6120_v2 = vpack.c.bf16 %v2571_v56, %v2570_v59 }
 0x1a8   : > { %6105 = vmatprep.subr.bf16.mxu0 %v6104_v62  ;;  %v7489_v5 = vpop.f32.mrb[24].mxu0 }
 0x1a9   : > { %6121 = vmatprep.subr.bf16.mxu1 %v6120_v2  ;;  %v2381_v10 = vmul.f32 0.70710677, %v7489_v5  ;;  %v7492_v32 = vpop.f32.mrb[24].mxu1  ;;  %6107 = vmatpush3.bf16.msra.mxu0 %v6104_v62  ;;  %v7494_v12 = vpop.f32.mrb[25].mxu0 }
 0x1aa   : > { %v2389_v14 = vmul.f32 0.70710677, %v7492_v32  ;;  %6123 = vmatpush3.bf16.msra.mxu1 %v6120_v2  ;;  %v2380_v16 = vmul.f32 0.70710677, %v7494_v12  ;;  %v7501_v21 = vpop.f32.mrb[25].mxu1  ;;  %v2284_v48 = vmul.f32 0.5, %v7494_v12 }
 0x1ab   : > { %6374 = verf.f32 %v2381_v10  ;;  %v2388_v24 = vmul.f32 0.70710677, %v7501_v21  ;;  %v2292_v17 = vmul.f32 0.5, %v7501_v21 }
 0x1ac   : > { %6376 = verf.f32 %v2389_v14  ;;  %5533 = vmatmul.mubr.msk.f32.vlgmr.msra.gmra.mrb[64].mxu0 %vm399_vm0, %v2269_v42  ;;  %v7506_v38 = vpop.f32.mrb[26].mxu0 }
 0x1ad   : > { %6378 = verf.f32 %v2380_v16  ;;  %5561 = vmatmul.mubr.msk.f32.vlgmr.msra.gmra.mrb[64].mxu1 %vm399_vm0, %v2277_v19  ;;  %v2383_v3 = vmul.f32 0.70710677, %v7506_v38  ;;  %v7510_v8 = vpop.f32.mrb[26].mxu1  ;;  %5535 = vmatprep.mubr.msk.f32.mxu0 %vm399_vm0, %v2270_v20  ;;  %v7513_v1 = vpop.f32.mrb[27].mxu0 }
 0x1ae   : > { %6380 = verf.f32 %v2388_v24  ;;  %v2391_v26 = vmul.f32 0.70710677, %v7510_v8  ;;  %5563 = vmatprep.mubr.msk.f32.mxu1 %vm399_vm0, %v2278_v23  ;;  %v7519_v28 = vpop.f32.mrb[27].mxu1  ;;  %v2382_v29 = vmul.f32 0.70710677, %v7513_v1 }
 0x1af   : > { %6382 = verf.f32 %v2383_v3  ;;  %v2390_v30 = vmul.f32 0.70710677, %v7519_v28 }
 0x1b0   : > { %6384 = verf.f32 %v2391_v26  ;;  %5536 = vmatmul.mubr.msk.f32.gmra.mrb[66].mxu0 %vm399_vm0, %v2271_v52  ;;  %v7526_v4 = vpop.f32.mrb[28].mxu0 }
 0x1b1   : > { %6386 = verf.f32 %v2382_v29  ;;  %5564 = vmatmul.mubr.msk.f32.gmra.mrb[66].mxu1 %vm399_vm0, %v2279_v25  ;;  %v2385_v7 = vmul.f32 0.70710677, %v7526_v4  ;;  %v7530_v63 = vpop.f32.mrb[28].mxu1  ;;  %5538 = vmatprep.mubr.msk.f32.mxu0 %vm399_vm0, %v2272_v41  ;;  %v7533_v9 = vpop.f32.mrb[29].mxu0 }
 0x1b2   : > { %6388 = verf.f32 %v2390_v30  ;;  %v2393_v11 = vmul.f32 0.70710677, %v7530_v63  ;;  %5566 = vmatprep.mubr.msk.f32.mxu1 %vm399_vm0, %v2280_v31  ;;  %v7539_v34 = vpop.f32.mrb[29].mxu1  ;;  %v2384_v37 = vmul.f32 0.70710677, %v7533_v9 }
 0x1b3   : > { %6390 = verf.f32 %v2385_v7  ;;  %v2392_v39 = vmul.f32 0.70710677, %v7539_v34 }
 0x1b4   : > { %6392 = verf.f32 %v2393_v11  ;;  %5539 = vmatmul.mubr.msk.f32.gmra.mrb[68].mxu0 %vm399_vm0, %v2273_v33  ;;  %v7546_v51 = vpop.f32.mrb[30].mxu0 }
 0x1b5   : > { %v6375_v57 = vpop.eup %6374  ;;  %6394 = verf.f32 %v2384_v37  ;;  %5567 = vmatmul.mubr.msk.f32.gmra.mrb[68].mxu1 %vm399_vm0, %v2281_v60  ;;  %v2387_v15 = vmul.f32 0.70710677, %v7546_v51  ;;  %v7551_v22 = vpop.f32.mrb[30].mxu1  ;;  %5541 = vmatprep.mubr.msk.f32.mxu0 %vm399_vm0, %v2274_v36 }
 0x1b6   : > { %v7554_v0 = vpop.f32.mrb[31].mxu0  ;;  %v6377_v6 = vpop.eup %6376  ;;  %v2573_v44 = vadd.f32 1.0, %v6375_v57  ;;  %6396 = verf.f32 %v2392_v39  ;;  %v2395_v45 = vmul.f32 0.70710677, %v7551_v22  ;;  %5569 = vmatprep.mubr.msk.f32.mxu1 %vm399_vm0, %v2282_v40 }
 0x1b7   : > { %v7559_v61 = vpop.f32.mrb[31].mxu1  ;;  %v6379_v46 = vpop.eup %6378  ;;  %v2581_v47 = vadd.f32 1.0, %v6377_v6  ;;  %6398 = verf.f32 %v2387_v15  ;;  %v2386_v27 = vmul.f32 0.70710677, %v7554_v0  ;;  %v2285_v15 = vmul.f32 0.5, %v7489_v5 }
 0x1b8   : > { %v6381_v49 = vpop.eup %6380  ;;  %v2572_v50 = vadd.f32 1.0, %v6379_v46  ;;  %6400 = verf.f32 %v2395_v45  ;;  %v2394_v13 = vmul.f32 0.70710677, %v7559_v61  ;;  %5542 = vmatmul.mubr.msk.f32.gmra.mrb[70].mxu0 %vm399_vm0, %v2275_v18  ;;  %v2286_v45 = vmul.f32 0.5, %v7513_v1 }
 0x1b9   : > { %v6383_v54 = vpop.eup %6382  ;;  %v2580_v55 = vadd.f32 1.0, %v6381_v49  ;;  %6402 = verf.f32 %v2386_v27  ;;  %5570 = vmatmul.mubr.msk.f32.gmra.mrb[70].mxu1 %vm399_vm0, %v2283_v43  ;;  %5588 = vmatprep.mubr.msk.f32.mxu0 %vm399_vm0, %v2284_v48  ;;  %v2295_v49 = vmul.f32 0.5, %v7510_v8 }
 0x1ba   : > { %v6385_v56 = vpop.eup %6384  ;;  %v2575_v53 = vadd.f32 1.0, %v6383_v54  ;;  %6404 = verf.f32 %v2394_v13  ;;  %5616 = vmatprep.mubr.msk.f32.mxu1 %vm399_vm0, %v2292_v17  ;;  %v6124_v58 = vpack.c.bf16 %v2573_v44, %v2572_v50  ;;  %v2293_v44 = vmul.f32 0.5, %v7492_v32 }
 0x1bb   : > { %v6387_v35 = vpop.eup %6386  ;;  %v2583_v59 = vadd.f32 1.0, %v6385_v56  ;;  %v6140_v62 = vpack.c.bf16 %v2581_v47, %v2580_v55  ;;  %v2294_v47 = vmul.f32 0.5, %v7519_v28  ;;  %v2287_v28 = vmul.f32 0.5, %v7506_v38 }
 0x1bc   : > { %v6389_v2 = vpop.eup %6388  ;;  %v2574_v10 = vadd.f32 1.0, %v6387_v35  ;;  %6125 = vmatprep.subr.bf16.mxu0 %v6124_v58  ;;  %v2288_v13 = vmul.f32 0.5, %v7533_v9  ;;  %v2296_v56 = vmul.f32 0.5, %v7539_v34  ;;  %v2297_v34 = vmul.f32 0.5, %v7530_v63 }
 0x1bd   : > { %v6391_v12 = vpop.eup %6390  ;;  %v2582_v42 = vadd.f32 1.0, %v6389_v2  ;;  %6141 = vmatprep.subr.bf16.mxu1 %v6140_v62  ;;  %6127 = vmatpush3.bf16.msra.mxu0 %v6124_v58  ;;  %v2289_v58 = vmul.f32 0.5, %v7526_v4 }
 0x1be   : > { %v6393_v14 = vpop.eup %6392  ;;  %v2577_v16 = vadd.f32 1.0, %v6391_v12  ;;  %6143 = vmatpush3.bf16.msra.mxu1 %v6140_v62  ;;  %v6128_v19 = vpack.c.bf16 %v2575_v53, %v2574_v10  ;;  %v2290_v62 = vmul.f32 0.5, %v7554_v0  ;;  %v2298_v12 = vmul.f32 0.5, %v7559_v61 }
 0x1bf   : > { %v6395_v20 = vpop.eup %6394  ;;  %v2585_v21 = vadd.f32 1.0, %v6393_v14  ;;  %v6144_v23 = vpack.c.bf16 %v2583_v59, %v2582_v42  ;;  %v2291_v42 = vmul.f32 0.5, %v7546_v51 }
 0x1c0   : > { %v6397_v24 = vpop.eup %6396  ;;  %v2576_v3 = vadd.f32 1.0, %v6395_v20  ;;  %6129 = vmatprep.subr.bf16.mxu0 %v6128_v19 }
 0x1c1   : > { %v6399_v52 = vpop.eup %6398  ;;  %v2584_v25 = vadd.f32 1.0, %v6397_v24  ;;  %6145 = vmatprep.subr.bf16.mxu1 %v6144_v23  ;;  %6131 = vmatpush3.bf16.msra.mxu0 %v6128_v19  ;;  %v2299_v19 = vmul.f32 0.5, %v7551_v22 }
 0x1c2   : > { %v6401_v26 = vpop.eup %6400  ;;  %v2579_v41 = vadd.f32 1.0, %v6399_v52  ;;  %6147 = vmatpush3.bf16.msra.mxu1 %v6144_v23  ;;  %v6132_v29 = vpack.c.bf16 %v2577_v16, %v2576_v3 }
 0x1c3   : > { %v6403_v30 = vpop.eup %6402  ;;  %v2587_v31 = vadd.f32 1.0, %v6401_v26  ;;  %v6148_v7 = vpack.c.bf16 %v2585_v21, %v2584_v25 }
 0x1c4   : > { %v6405_v33 = vpop.eup %6404  ;;  %v2578_v60 = vadd.f32 1.0, %v6403_v30  ;;  %6133 = vmatprep.subr.bf16.mxu0 %v6132_v29 }
 0x1c5   : > { %v2586_v11 = vadd.f32 1.0, %v6405_v33  ;;  %6149 = vmatprep.subr.bf16.mxu1 %v6148_v7  ;;  %6135 = vmatpush3.bf16.msra.mxu0 %v6132_v29 }
 0x1c6   : > { %6151 = vmatpush3.bf16.msra.mxu1 %v6148_v7  ;;  %v6136_v36 = vpack.c.bf16 %v2579_v41, %v2578_v60 }
 0x1c7   : > { %v6152_v37 = vpack.c.bf16 %v2587_v31, %v2586_v11 }
 0x1c8   : > { %6137 = vmatprep.subr.bf16.mxu0 %v6136_v36  ;;  %v7569_v39 = vpop.f32.mrb[32].mxu0 }
 0x1c9   : > { %6153 = vmatprep.subr.bf16.mxu1 %v6152_v37  ;;  %v2397_v40 = vmul.f32 0.70710677, %v7569_v39  ;;  %v7572_v57 = vpop.f32.mrb[32].mxu1  ;;  %6139 = vmatpush3.bf16.msra.mxu0 %v6136_v36  ;;  %v7574_v18 = vpop.f32.mrb[33].mxu0 }
 0x1ca   : > { %v2405_v6 = vmul.f32 0.70710677, %v7572_v57  ;;  %6155 = vmatpush3.bf16.msra.mxu1 %v6152_v37  ;;  %v2396_v43 = vmul.f32 0.70710677, %v7574_v18  ;;  %v7581_v46 = vpop.f32.mrb[33].mxu1  ;;  %v2300_v3 = vmul.f32 0.5, %v7574_v18 }
 0x1cb   : > { %6406 = verf.f32 %v2397_v40  ;;  %v2404_v48 = vmul.f32 0.70710677, %v7581_v46  ;;  %v2308_v41 = vmul.f32 0.5, %v7581_v46 }
 0x1cc   : > { %6408 = verf.f32 %v2405_v6  ;;  %5589 = vmatmul.mubr.msk.f32.vlgmr.msra.gmra.mrb[72].mxu0 %vm399_vm0, %v2285_v15  ;;  %v7586_v5 = vpop.f32.mrb[34].mxu0 }
 0x1cd   : > { %6410 = verf.f32 %v2396_v43  ;;  %5617 = vmatmul.mubr.msk.f32.vlgmr.msra.gmra.mrb[72].mxu1 %vm399_vm0, %v2293_v44  ;;  %v2399_v27 = vmul.f32 0.70710677, %v7586_v5  ;;  %v7590_v32 = vpop.f32.mrb[34].mxu1  ;;  %5591 = vmatprep.mubr.msk.f32.mxu0 %vm399_vm0, %v2286_v45  ;;  %v7593_v1 = vpop.f32.mrb[35].mxu0 }
 0x1ce   : > { %6412 = verf.f32 %v2404_v48  ;;  %v2407_v50 = vmul.f32 0.70710677, %v7590_v32  ;;  %5619 = vmatprep.mubr.msk.f32.mxu1 %vm399_vm0, %v2294_v47  ;;  %v7599_v17 = vpop.f32.mrb[35].mxu1  ;;  %v2398_v54 = vmul.f32 0.70710677, %v7593_v1 }
 0x1cf   : > { %6414 = verf.f32 %v2399_v27  ;;  %v2406_v55 = vmul.f32 0.70710677, %v7599_v17 }
 0x1d0   : > { %6416 = verf.f32 %v2407_v50  ;;  %5592 = vmatmul.mubr.msk.f32.gmra.mrb[74].mxu0 %vm399_vm0, %v2287_v28  ;;  %v7606_v38 = vpop.f32.mrb[36].mxu0 }
 0x1d1   : > { %6418 = verf.f32 %v2398_v54  ;;  %5620 = vmatmul.mubr.msk.f32.gmra.mrb[74].mxu1 %vm399_vm0, %v2295_v49  ;;  %v2401_v8 = vmul.f32 0.70710677, %v7606_v38  ;;  %v7610_v53 = vpop.f32.mrb[36].mxu1  ;;  %5594 = vmatprep.mubr.msk.f32.mxu0 %vm399_vm0, %v2288_v13  ;;  %v7613_v9 = vpop.f32.mrb[37].mxu0 }
 0x1d2   : > { %6420 = verf.f32 %v2406_v55  ;;  %v2409_v35 = vmul.f32 0.70710677, %v7610_v53  ;;  %5622 = vmatprep.mubr.msk.f32.mxu1 %vm399_vm0, %v2296_v56  ;;  %v7619_v59 = vpop.f32.mrb[37].mxu1  ;;  %v2400_v2 = vmul.f32 0.70710677, %v7613_v9 }
 0x1d3   : > { %6422 = verf.f32 %v2401_v8  ;;  %v2408_v10 = vmul.f32 0.70710677, %v7619_v59 }
 0x1d4   : > { %6424 = verf.f32 %v2409_v35  ;;  %5595 = vmatmul.mubr.msk.f32.gmra.mrb[76].mxu0 %vm399_vm0, %v2289_v58  ;;  %v7626_v4 = vpop.f32.mrb[38].mxu0 }
 0x1d5   : > { %v6407_v63 = vpop.eup %6406  ;;  %6426 = verf.f32 %v2400_v2  ;;  %5623 = vmatmul.mubr.msk.f32.gmra.mrb[76].mxu1 %vm399_vm0, %v2297_v34  ;;  %v2403_v0 = vmul.f32 0.70710677, %v7626_v4  ;;  %v7631_v14 = vpop.f32.mrb[38].mxu1  ;;  %5597 = vmatprep.mubr.msk.f32.mxu0 %vm399_vm0, %v2290_v62 }
 0x1d6   : > { %v7634_v16 = vpop.f32.mrb[39].mxu0  ;;  %v6409_v61 = vpop.eup %6408  ;;  %v2589_v20 = vadd.f32 1.0, %v6407_v63  ;;  %6428 = verf.f32 %v2408_v10  ;;  %v2411_v21 = vmul.f32 0.70710677, %v7631_v14  ;;  %5625 = vmatprep.mubr.msk.f32.mxu1 %vm399_vm0, %v2298_v12 }
 0x1d7   : > { %v7639_v51 = vpop.f32.mrb[39].mxu1  ;;  %v6411_v23 = vpop.eup %6410  ;;  %v2597_v24 = vadd.f32 1.0, %v6409_v61  ;;  %6430 = verf.f32 %v2403_v0  ;;  %v2402_v52 = vmul.f32 0.70710677, %v7634_v16  ;;  %v2301_v0 = vmul.f32 0.5, %v7569_v39 }
 0x1d8   : > { %v6413_v25 = vpop.eup %6412  ;;  %v2588_v26 = vadd.f32 1.0, %v6411_v23  ;;  %6432 = verf.f32 %v2411_v21  ;;  %v2410_v22 = vmul.f32 0.70710677, %v7639_v51  ;;  %5598 = vmatmul.mubr.msk.f32.gmra.mrb[78].mxu0 %vm399_vm0, %v2291_v42  ;;  %v2302_v21 = vmul.f32 0.5, %v7593_v1 }
 0x1d9   : > { %v6415_v29 = vpop.eup %6414  ;;  %v2596_v30 = vadd.f32 1.0, %v6413_v25  ;;  %6434 = verf.f32 %v2402_v52  ;;  %5626 = vmatmul.mubr.msk.f32.gmra.mrb[78].mxu1 %vm399_vm0, %v2299_v19  ;;  %5644 = vmatprep.mubr.msk.f32.mxu0 %vm399_vm0, %v2300_v3  ;;  %v2311_v25 = vmul.f32 0.5, %v7590_v32 }
 0x1da   : > { %v6417_v31 = vpop.eup %6416  ;;  %v2591_v7 = vadd.f32 1.0, %v6415_v29  ;;  %6436 = verf.f32 %v2410_v22  ;;  %5672 = vmatprep.mubr.msk.f32.mxu1 %vm399_vm0, %v2308_v41  ;;  %v6156_v33 = vpack.c.bf16 %v2589_v20, %v2588_v26  ;;  %v2309_v20 = vmul.f32 0.5, %v7572_v57 }
 0x1db   : > { %v6419_v60 = vpop.eup %6418  ;;  %v2599_v11 = vadd.f32 1.0, %v6417_v31  ;;  %v6172_v36 = vpack.c.bf16 %v2597_v24, %v2596_v30  ;;  %v2310_v24 = vmul.f32 0.5, %v7599_v17  ;;  %v2303_v17 = vmul.f32 0.5, %v7586_v5 }
 0x1dc   : > { %v6421_v37 = vpop.eup %6420  ;;  %v2590_v40 = vadd.f32 1.0, %v6419_v60  ;;  %6157 = vmatprep.subr.bf16.mxu0 %v6156_v33  ;;  %v2304_v22 = vmul.f32 0.5, %v7613_v9  ;;  %v2312_v31 = vmul.f32 0.5, %v7619_v59  ;;  %v2313_v59 = vmul.f32 0.5, %v7610_v53 }
 0x1dd   : > { %v6423_v18 = vpop.eup %6422  ;;  %v2598_v15 = vadd.f32 1.0, %v6421_v37  ;;  %6173 = vmatprep.subr.bf16.mxu1 %v6172_v36  ;;  %6159 = vmatpush3.bf16.msra.mxu0 %v6156_v33  ;;  %v2305_v33 = vmul.f32 0.5, %v7606_v38 }
 0x1de   : > { %v6425_v6 = vpop.eup %6424  ;;  %v2593_v43 = vadd.f32 1.0, %v6423_v18  ;;  %6175 = vmatpush3.bf16.msra.mxu1 %v6172_v36  ;;  %v6160_v44 = vpack.c.bf16 %v2591_v7, %v2590_v40  ;;  %v2306_v36 = vmul.f32 0.5, %v7634_v16  ;;  %v2314_v18 = vmul.f32 0.5, %v7639_v51 }
 0x1df   : > { %v6427_v45 = vpop.eup %6426  ;;  %v2601_v46 = vadd.f32 1.0, %v6425_v6  ;;  %v6176_v47 = vpack.c.bf16 %v2599_v11, %v2598_v15  ;;  %v2307_v15 = vmul.f32 0.5, %v7626_v4 }
 0x1e0   : > { %v6429_v48 = vpop.eup %6428  ;;  %v2592_v27 = vadd.f32 1.0, %v6427_v45  ;;  %6161 = vmatprep.subr.bf16.mxu0 %v6160_v44 }
 0x1e1   : > { %v6431_v28 = vpop.eup %6430  ;;  %v2600_v49 = vadd.f32 1.0, %v6429_v48  ;;  %6177 = vmatprep.subr.bf16.mxu1 %v6176_v47  ;;  %6163 = vmatpush3.bf16.msra.mxu0 %v6160_v44  ;;  %v2315_v44 = vmul.f32 0.5, %v7631_v14 }
 0x1e2   : > { %v6433_v50 = vpop.eup %6432  ;;  %v2595_v13 = vadd.f32 1.0, %v6431_v28  ;;  %6179 = vmatpush3.bf16.msra.mxu1 %v6176_v47  ;;  %v6164_v54 = vpack.c.bf16 %v2593_v43, %v2592_v27 }
 0x1e3   : > { %v6435_v55 = vpop.eup %6434  ;;  %v2603_v56 = vadd.f32 1.0, %v6433_v50  ;;  %v6180_v8 = vpack.c.bf16 %v2601_v46, %v2600_v49 }
 0x1e4   : > { %v6437_v58 = vpop.eup %6436  ;;  %v2594_v34 = vadd.f32 1.0, %v6435_v55  ;;  %6165 = vmatprep.subr.bf16.mxu0 %v6164_v54 }
 0x1e5   : > { %v2602_v35 = vadd.f32 1.0, %v6437_v58  ;;  %6181 = vmatprep.subr.bf16.mxu1 %v6180_v8  ;;  %6167 = vmatpush3.bf16.msra.mxu0 %v6164_v54 }
 0x1e6   : > { %6183 = vmatpush3.bf16.msra.mxu1 %v6180_v8  ;;  %v6168_v62 = vpack.c.bf16 %v2595_v13, %v2594_v34 }
 0x1e7   : > { %v6184_v2 = vpack.c.bf16 %v2603_v56, %v2602_v35 }
 0x1e8   : > { %6169 = vmatprep.subr.bf16.mxu0 %v6168_v62  ;;  %v7649_v10 = vpop.f32.mrb[40].mxu0 }
 0x1e9   : > { %6185 = vmatprep.subr.bf16.mxu1 %v6184_v2  ;;  %v2413_v12 = vmul.f32 0.70710677, %v7649_v10  ;;  %v7652_v63 = vpop.f32.mrb[40].mxu1  ;;  %6171 = vmatpush3.bf16.msra.mxu0 %v6168_v62  ;;  %v7654_v42 = vpop.f32.mrb[41].mxu0 }
 0x1ea   : > { %v2421_v61 = vmul.f32 0.70710677, %v7652_v63  ;;  %6187 = vmatpush3.bf16.msra.mxu1 %v6184_v2  ;;  %v2412_v19 = vmul.f32 0.70710677, %v7654_v42  ;;  %v7661_v23 = vpop.f32.mrb[41].mxu1  ;;  %v2316_v27 = vmul.f32 0.5, %v7654_v42 }
 0x1eb   : > { %6438 = verf.f32 %v2413_v12  ;;  %v2420_v3 = vmul.f32 0.70710677, %v7661_v23  ;;  %v2324_v13 = vmul.f32 0.5, %v7661_v23 }
 0x1ec   : > { %6440 = verf.f32 %v2421_v61  ;;  %5645 = vmatmul.mubr.msk.f32.vlgmr.msra.gmra.mrb[80].mxu0 %vm399_vm0, %v2301_v0  ;;  %v7666_v39 = vpop.f32.mrb[42].mxu0 }
 0x1ed   : > { %6442 = verf.f32 %v2412_v19  ;;  %5673 = vmatmul.mubr.msk.f32.vlgmr.msra.gmra.mrb[80].mxu1 %vm399_vm0, %v2309_v20  ;;  %v2415_v52 = vmul.f32 0.70710677, %v7666_v39  ;;  %v7670_v57 = vpop.f32.mrb[42].mxu1  ;;  %5647 = vmatprep.mubr.msk.f32.mxu0 %vm399_vm0, %v2302_v21  ;;  %v7673_v1 = vpop.f32.mrb[43].mxu0 }
 0x1ee   : > { %6444 = verf.f32 %v2420_v3  ;;  %v2423_v26 = vmul.f32 0.70710677, %v7670_v57  ;;  %5675 = vmatprep.mubr.msk.f32.mxu1 %vm399_vm0, %v2310_v24  ;;  %v7679_v41 = vpop.f32.mrb[43].mxu1  ;;  %v2414_v29 = vmul.f32 0.70710677, %v7673_v1 }
 0x1ef   : > { %6446 = verf.f32 %v2415_v52  ;;  %v2422_v30 = vmul.f32 0.70710677, %v7679_v41 }
 0x1f0   : > { %6448 = verf.f32 %v2423_v26  ;;  %5648 = vmatmul.mubr.msk.f32.gmra.mrb[82].mxu0 %vm399_vm0, %v2303_v17  ;;  %v7686_v5 = vpop.f32.mrb[44].mxu0 }
 0x1f1   : > { %6450 = verf.f32 %v2414_v29  ;;  %5676 = vmatmul.mubr.msk.f32.gmra.mrb[82].mxu1 %vm399_vm0, %v2311_v25  ;;  %v2417_v32 = vmul.f32 0.70710677, %v7686_v5  ;;  %v7690_v7 = vpop.f32.mrb[44].mxu1  ;;  %5650 = vmatprep.mubr.msk.f32.mxu0 %vm399_vm0, %v2304_v22  ;;  %v7693_v9 = vpop.f32.mrb[45].mxu0 }
 0x1f2   : > { %6452 = verf.f32 %v2422_v30  ;;  %v2425_v60 = vmul.f32 0.70710677, %v7690_v7  ;;  %5678 = vmatprep.mubr.msk.f32.mxu1 %vm399_vm0, %v2312_v31  ;;  %v7699_v11 = vpop.f32.mrb[45].mxu1  ;;  %v2416_v37 = vmul.f32 0.70710677, %v7693_v9 }
 0x1f3   : > { %6454 = verf.f32 %v2417_v32  ;;  %v2424_v40 = vmul.f32 0.70710677, %v7699_v11 }
 0x1f4   : > { %6456 = verf.f32 %v2425_v60  ;;  %5651 = vmatmul.mubr.msk.f32.gmra.mrb[84].mxu0 %vm399_vm0, %v2305_v33  ;;  %v7706_v38 = vpop.f32.mrb[46].mxu0 }
 0x1f5   : > { %v6439_v53 = vpop.eup %6438  ;;  %6458 = verf.f32 %v2416_v37  ;;  %5679 = vmatmul.mubr.msk.f32.gmra.mrb[84].mxu1 %vm399_vm0, %v2313_v59  ;;  %v2419_v16 = vmul.f32 0.70710677, %v7706_v38  ;;  %v7711_v6 = vpop.f32.mrb[46].mxu1  ;;  %5653 = vmatprep.mubr.msk.f32.mxu0 %vm399_vm0, %v2306_v36 }
 0x1f6   : > { %v7714_v43 = vpop.f32.mrb[47].mxu0  ;;  %v6441_v51 = vpop.eup %6440  ;;  %v2605_v45 = vadd.f32 1.0, %v6439_v53  ;;  %6460 = verf.f32 %v2424_v40  ;;  %v2427_v46 = vmul.f32 0.70710677, %v7711_v6  ;;  %5681 = vmatprep.mubr.msk.f32.mxu1 %vm399_vm0, %v2314_v18  ;;  %v2317_v40 = vmul.f32 0.5, %v7649_v10 }
 0x1f7   : > { %v7719_v4 = vpop.f32.mrb[47].mxu1  ;;  %v6443_v47 = vpop.eup %6442  ;;  %v2613_v48 = vadd.f32 1.0, %v6441_v51  ;;  %6462 = verf.f32 %v2419_v16  ;;  %v2418_v28 = vmul.f32 0.70710677, %v7714_v43  ;;  %v2325_v18 = vmul.f32 0.5, %v7652_v63 }
 0x1f8   : > { %v6445_v49 = vpop.eup %6444  ;;  %v2604_v50 = vadd.f32 1.0, %v6443_v47  ;;  %6464 = verf.f32 %v2427_v46  ;;  %v2426_v14 = vmul.f32 0.70710677, %v7719_v4  ;;  %5654 = vmatmul.mubr.msk.f32.gmra.mrb[86].mxu0 %vm399_vm0, %v2307_v15  ;;  %v2318_v53 = vmul.f32 0.5, %v7673_v1 }
 0x1f9   : > { %v6447_v54 = vpop.eup %6446  ;;  %v2612_v55 = vadd.f32 1.0, %v6445_v49  ;;  %6466 = verf.f32 %v2418_v28  ;;  %5682 = vmatmul.mubr.msk.f32.gmra.mrb[86].mxu1 %vm399_vm0, %v2315_v44  ;;  %5700 = vmatprep.mubr.msk.f32.mxu0 %vm399_vm0, %v2316_v27  ;;  %v2326_v15 = vmul.f32 0.5, %v7679_v41  ;;  %v2319_v16 = vmul.f32 0.5, %v7666_v39 }
 0x1fa   : > { %v6449_v56 = vpop.eup %6448  ;;  %v2607_v8 = vadd.f32 1.0, %v6447_v54  ;;  %6468 = verf.f32 %v2426_v14  ;;  %5728 = vmatprep.mubr.msk.f32.mxu1 %vm399_vm0, %v2324_v13  ;;  %v6188_v58 = vpack.c.bf16 %v2605_v45, %v2604_v50  ;;  %v2327_v51 = vmul.f32 0.5, %v7670_v57 }
 0x1fb   : > { %v6451_v34 = vpop.eup %6450  ;;  %v2615_v35 = vadd.f32 1.0, %v6449_v56  ;;  %v6204_v62 = vpack.c.bf16 %v2613_v48, %v2612_v55  ;;  %v2320_v10 = vmul.f32 0.5, %v7693_v9  ;;  %v2328_v63 = vmul.f32 0.5, %v7699_v11 }
 0x1fc   : > { %v6453_v2 = vpop.eup %6452  ;;  %v2606_v12 = vadd.f32 1.0, %v6451_v34  ;;  %6189 = vmatprep.subr.bf16.mxu0 %v6188_v58  ;;  %v2321_v1 = vmul.f32 0.5, %v7686_v5  ;;  %v2329_v39 = vmul.f32 0.5, %v7690_v7  ;;  %v2322_v41 = vmul.f32 0.5, %v7714_v43 }
 0x1fd   : > { %v6455_v42 = vpop.eup %6454  ;;  %v2614_v0 = vadd.f32 1.0, %v6453_v2  ;;  %6205 = vmatprep.subr.bf16.mxu1 %v6204_v62  ;;  %6191 = vmatpush3.bf16.msra.mxu0 %v6188_v58  ;;  %v2330_v57 = vmul.f32 0.5, %v7719_v4  ;;  %v2323_v9 = vmul.f32 0.5, %v7706_v38  ;;  %v2331_v5 = vmul.f32 0.5, %v7711_v6 }
 0x1fe   : > { %v6457_v61 = vpop.eup %6456  ;;  %v2609_v19 = vadd.f32 1.0, %v6455_v42  ;;  %6207 = vmatpush3.bf16.msra.mxu1 %v6204_v62  ;;  %v6192_v20 = vpack.c.bf16 %v2607_v8, %v2606_v12 }
 0x1ff   : > { %v6459_v21 = vpop.eup %6458  ;;  %v2617_v23 = vadd.f32 1.0, %v6457_v61  ;;  %v6208_v24 = vpack.c.bf16 %v2615_v35, %v2614_v0 }
 0x200   : > { %v6461_v3 = vpop.eup %6460  ;;  %v2608_v52 = vadd.f32 1.0, %v6459_v21  ;;  %6193 = vmatprep.subr.bf16.mxu0 %v6192_v20 }
 0x201   : > { %v6463_v17 = vpop.eup %6462  ;;  %v2616_v25 = vadd.f32 1.0, %v6461_v3  ;;  %6209 = vmatprep.subr.bf16.mxu1 %v6208_v24  ;;  %6195 = vmatpush3.bf16.msra.mxu0 %v6192_v20 }
 0x202   : > { %v6465_v26 = vpop.eup %6464  ;;  %v2611_v22 = vadd.f32 1.0, %v6463_v17  ;;  %6211 = vmatpush3.bf16.msra.mxu1 %v6208_v24  ;;  %v6196_v29 = vpack.c.bf16 %v2609_v19, %v2608_v52 }
 0x203   : > { %v6467_v30 = vpop.eup %6466  ;;  %v2619_v31 = vadd.f32 1.0, %v6465_v26  ;;  %v6212_v32 = vpack.c.bf16 %v2617_v23, %v2616_v25 }
 0x204   : > { %v6469_v33 = vpop.eup %6468  ;;  %v2610_v59 = vadd.f32 1.0, %v6467_v30  ;;  %6197 = vmatprep.subr.bf16.mxu0 %v6196_v29 }
 0x205   : > { %v2618_v60 = vadd.f32 1.0, %v6469_v33  ;;  %6213 = vmatprep.subr.bf16.mxu1 %v6212_v32  ;;  %6199 = vmatpush3.bf16.msra.mxu0 %v6196_v29 }
 0x206   : > { %6215 = vmatpush3.bf16.msra.mxu1 %v6212_v32  ;;  %v6200_v36 = vpack.c.bf16 %v2611_v22, %v2610_v59 }
 0x207   : > { %v6216_v37 = vpack.c.bf16 %v2619_v31, %v2618_v60 }
 0x208   : > { %6201 = vmatprep.subr.bf16.mxu0 %v6200_v36 }
 0x209   : > { %6217 = vmatprep.subr.bf16.mxu1 %v6216_v37  ;;  %6203 = vmatpush3.bf16.msra.mxu0 %v6200_v36 }
 0x20a   : > { %6219 = vmatpush3.bf16.msra.mxu1 %v6216_v37 }
 0x20c   : > { %5701 = vmatmul.mubr.msk.f32.vlgmr.msra.gmra.mrb[88].mxu0 %vm399_vm0, %v2317_v40 }
 0x20d   : > { %5729 = vmatmul.mubr.msk.f32.vlgmr.msra.gmra.mrb[88].mxu1 %vm399_vm0, %v2325_v18  ;;  %5703 = vmatprep.mubr.msk.f32.mxu0 %vm399_vm0, %v2318_v53 }
 0x20e   : > { %5731 = vmatprep.mubr.msk.f32.mxu1 %vm399_vm0, %v2326_v15 }
 0x210   : > { %5704 = vmatmul.mubr.msk.f32.gmra.mrb[90].mxu0 %vm399_vm0, %v2319_v16 }
 0x211   : > { %5732 = vmatmul.mubr.msk.f32.gmra.mrb[90].mxu1 %vm399_vm0, %v2327_v51  ;;  %5706 = vmatprep.mubr.msk.f32.mxu0 %vm399_vm0, %v2320_v10 }
 0x212   : > { %5734 = vmatprep.mubr.msk.f32.mxu1 %vm399_vm0, %v2328_v63 }
 0x214   : > { %5707 = vmatmul.mubr.msk.f32.gmra.mrb[92].mxu0 %vm399_vm0, %v2321_v1 }
 0x215   : > { %5735 = vmatmul.mubr.msk.f32.gmra.mrb[92].mxu1 %vm399_vm0, %v2329_v39  ;;  %5709 = vmatprep.mubr.msk.f32.mxu0 %vm399_vm0, %v2322_v41 }
 0x216   : > { %5737 = vmatprep.mubr.msk.f32.mxu1 %vm399_vm0, %v2330_v57 }
 0x218   : > { %5710 = vmatmul.mubr.msk.f32.gmra.mrb[94].mxu0 %vm399_vm0, %v2323_v9 }
 0x219   : > { %5738 = vmatmul.mubr.msk.f32.gmra.mrb[94].mxu1 %vm399_vm0, %v2331_v5 }
 0x23f   : > { %v5422_v7 = vpop.f32.mrb[48].mxu0 }
 0x240   : > { %4169 = vst.msk [vmem:[%s7758_s19 + $0x8] sm:$0xff] %vm399_vm0, %v5422_v7  ;;  %v5450_v11 = vpop.f32.mrb[48].mxu1  ;;  %v2710_v38 = vpop.f32.mrb[49].mxu0 }
 0x241   : > { %4177 = vst.msk [vmem:[%s7758_s19 + $0x48] sm:$0xff] %vm399_vm0, %v5450_v11  ;;  %4168 = vst.msk [vmem:[%s7758_s19] sm:$0xff] %vm399_vm0, %v2710_v38  ;;  %v2839_v6 = vpop.f32.mrb[49].mxu1 }
 0x242   : > { %4176 = vst.msk [vmem:[%s7758_s19 + $0x40] sm:$0xff] %vm399_vm0, %v2839_v6 }
 0x243   : > { %v5425_v43 = vpop.f32.mrb[50].mxu0 }
 0x244   : > { %4171 = vst.msk [vmem:[%s7758_s19 + $0x18] sm:$0xff] %vm399_vm0, %v5425_v43  ;;  %v5453_v44 = vpop.f32.mrb[50].mxu1  ;;  %v2720_v45 = vpop.f32.mrb[51].mxu0 }
 0x245   : > { %4179 = vst.msk [vmem:[%s7758_s19 + $0x58] sm:$0xff] %vm399_vm0, %v5453_v44  ;;  %4170 = vst.msk [vmem:[%s7758_s19 + $0x10] sm:$0xff] %vm399_vm0, %v2720_v45  ;;  %v2849_v46 = vpop.f32.mrb[51].mxu1 }
 0x246   : > { %4178 = vst.msk [vmem:[%s7758_s19 + $0x50] sm:$0xff] %vm399_vm0, %v2849_v46 }
 0x247   : > { %v5428_v4 = vpop.f32.mrb[52].mxu0 }
 0x248   : > { %4173 = vst.msk [vmem:[%s7758_s19 + $0x28] sm:$0xff] %vm399_vm0, %v5428_v4  ;;  %v5456_v47 = vpop.f32.mrb[52].mxu1  ;;  %v2730_v48 = vpop.f32.mrb[53].mxu0 }
 0x249   : > { %4181 = vst.msk [vmem:[%s7758_s19 + $0x68] sm:$0xff] %vm399_vm0, %v5456_v47  ;;  %4172 = vst.msk [vmem:[%s7758_s19 + $0x20] sm:$0xff] %vm399_vm0, %v2730_v48  ;;  %v2859_v27 = vpop.f32.mrb[53].mxu1 }
 0x24a   : > { %4180 = vst.msk [vmem:[%s7758_s19 + $0x60] sm:$0xff] %vm399_vm0, %v2859_v27 }
 0x24b   : > { %v5431_v28 = vpop.f32.mrb[54].mxu0 }
 0x24c   : > { %4175 = vst.msk [vmem:[%s7758_s19 + $0x38] sm:$0xff] %vm399_vm0, %v5431_v28  ;;  %v5459_v49 = vpop.f32.mrb[54].mxu1  ;;  %v2740_v50 = vpop.f32.mrb[55].mxu0 }
 0x24d   : > { %4183 = vst.msk [vmem:[%s7758_s19 + $0x78] sm:$0xff] %vm399_vm0, %v5459_v49  ;;  %4174 = vst.msk [vmem:[%s7758_s19 + $0x30] sm:$0xff] %vm399_vm0, %v2740_v50  ;;  %v2869_v13 = vpop.f32.mrb[55].mxu1 }
 0x24e   : > { %4182 = vst.msk [vmem:[%s7758_s19 + $0x70] sm:$0xff] %vm399_vm0, %v2869_v13 }
 0x25f   : > { %v5478_v14 = vpop.f32.mrb[56].mxu0 }
 0x260   : > { %4185 = vst.msk [vmem:[%s7758_s19 + $0x88] sm:$0xff] %vm399_vm0, %v5478_v14  ;;  %v5506_v54 = vpop.f32.mrb[56].mxu1  ;;  %v2968_v55 = vpop.f32.mrb[57].mxu0 }
 0x261   : > { %4193 = vst.msk [vmem:[%s7758_s19 + $0xc8] sm:$0xff] %vm399_vm0, %v5506_v54  ;;  %4184 = vst.msk [vmem:[%s7758_s19 + $0x80] sm:$0xff] %vm399_vm0, %v2968_v55  ;;  %v3097_v56 = vpop.f32.mrb[57].mxu1 }
 0x262   : > { %4192 = vst.msk [vmem:[%s7758_s19 + $0xc0] sm:$0xff] %vm399_vm0, %v3097_v56 }
 0x263   : > { %v5481_v8 = vpop.f32.mrb[58].mxu0 }
 0x264   : > { %4187 = vst.msk [vmem:[%s7758_s19 + $0x98] sm:$0xff] %vm399_vm0, %v5481_v8  ;;  %v5509_v58 = vpop.f32.mrb[58].mxu1  ;;  %v2978_v34 = vpop.f32.mrb[59].mxu0 }
 0x265   : > { %4195 = vst.msk [vmem:[%s7758_s19 + $0xd8] sm:$0xff] %vm399_vm0, %v5509_v58  ;;  %4186 = vst.msk [vmem:[%s7758_s19 + $0x90] sm:$0xff] %vm399_vm0, %v2978_v34  ;;  %v3107_v35 = vpop.f32.mrb[59].mxu1 }
 0x266   : > { %4194 = vst.msk [vmem:[%s7758_s19 + $0xd0] sm:$0xff] %vm399_vm0, %v3107_v35 }
 0x267   : > { %v5484_v62 = vpop.f32.mrb[60].mxu0 }
 0x268   : > { %4189 = vst.msk [vmem:[%s7758_s19 + $0xa8] sm:$0xff] %vm399_vm0, %v5484_v62  ;;  %v5512_v2 = vpop.f32.mrb[60].mxu1  ;;  %v2988_v12 = vpop.f32.mrb[61].mxu0 }
 0x269   : > { %4197 = vst.msk [vmem:[%s7758_s19 + $0xe8] sm:$0xff] %vm399_vm0, %v5512_v2  ;;  %4188 = vst.msk [vmem:[%s7758_s19 + $0xa0] sm:$0xff] %vm399_vm0, %v2988_v12  ;;  %v3117_v42 = vpop.f32.mrb[61].mxu1 }
 0x26a   : > { %4196 = vst.msk [vmem:[%s7758_s19 + $0xe0] sm:$0xff] %vm399_vm0, %v3117_v42 }
 0x26b   : > { %v5487_v0 = vpop.f32.mrb[62].mxu0 }
 0x26c   : > { %4191 = vst.msk [vmem:[%s7758_s19 + $0xb8] sm:$0xff] %vm399_vm0, %v5487_v0  ;;  %v5515_v61 = vpop.f32.mrb[62].mxu1  ;;  %v2998_v19 = vpop.f32.mrb[63].mxu0 }
 0x26d   : > { %4199 = vst.msk [vmem:[%s7758_s19 + $0xf8] sm:$0xff] %vm399_vm0, %v5515_v61  ;;  %4190 = vst.msk [vmem:[%s7758_s19 + $0xb0] sm:$0xff] %vm399_vm0, %v2998_v19  ;;  %v3127_v20 = vpop.f32.mrb[63].mxu1 }
 0x26e   : > { %4198 = vst.msk [vmem:[%s7758_s19 + $0xf0] sm:$0xff] %vm399_vm0, %v3127_v20 }
 0x27f   : > { %v5534_v21 = vpop.f32.mrb[64].mxu0 }
 0x280   : > { %4201 = vst.msk [vmem:[%s7758_s19 + $0x108] sm:$0xff] %vm399_vm0, %v5534_v21  ;;  %v5562_v23 = vpop.f32.mrb[64].mxu1  ;;  %v3226_v24 = vpop.f32.mrb[65].mxu0 }
 0x281   : > { %4209 = vst.msk [vmem:[%s7758_s19 + $0x148] sm:$0xff] %vm399_vm0, %v5562_v23  ;;  %4200 = vst.msk [vmem:[%s7758_s19 + $0x100] sm:$0xff] %vm399_vm0, %v3226_v24  ;;  %v3355_v3 = vpop.f32.mrb[65].mxu1 }
 0x282   : > { %4208 = vst.msk [vmem:[%s7758_s19 + $0x140] sm:$0xff] %vm399_vm0, %v3355_v3 }
 0x283   : > { %v5537_v52 = vpop.f32.mrb[66].mxu0 }
 0x284   : > { %4203 = vst.msk [vmem:[%s7758_s19 + $0x118] sm:$0xff] %vm399_vm0, %v5537_v52  ;;  %v5565_v17 = vpop.f32.mrb[66].mxu1  ;;  %v3236_v25 = vpop.f32.mrb[67].mxu0 }
 0x285   : > { %4211 = vst.msk [vmem:[%s7758_s19 + $0x158] sm:$0xff] %vm399_vm0, %v5565_v17  ;;  %4202 = vst.msk [vmem:[%s7758_s19 + $0x110] sm:$0xff] %vm399_vm0, %v3236_v25  ;;  %v3365_v26 = vpop.f32.mrb[67].mxu1 }
 0x286   : > { %4210 = vst.msk [vmem:[%s7758_s19 + $0x150] sm:$0xff] %vm399_vm0, %v3365_v26 }
 0x287   : > { %v5540_v22 = vpop.f32.mrb[68].mxu0 }
 0x288   : > { %4205 = vst.msk [vmem:[%s7758_s19 + $0x128] sm:$0xff] %vm399_vm0, %v5540_v22  ;;  %v5568_v29 = vpop.f32.mrb[68].mxu1  ;;  %v3246_v30 = vpop.f32.mrb[69].mxu0 }
 0x289   : > { %4213 = vst.msk [vmem:[%s7758_s19 + $0x168] sm:$0xff] %vm399_vm0, %v5568_v29  ;;  %4204 = vst.msk [vmem:[%s7758_s19 + $0x120] sm:$0xff] %vm399_vm0, %v3246_v30  ;;  %v3375_v31 = vpop.f32.mrb[69].mxu1 }
 0x28a   : > { %4212 = vst.msk [vmem:[%s7758_s19 + $0x160] sm:$0xff] %vm399_vm0, %v3375_v31 }
 0x28b   : > { %v5543_v32 = vpop.f32.mrb[70].mxu0 }
 0x28c   : > { %4207 = vst.msk [vmem:[%s7758_s19 + $0x138] sm:$0xff] %vm399_vm0, %v5543_v32  ;;  %v5571_v33 = vpop.f32.mrb[70].mxu1  ;;  %v3256_v59 = vpop.f32.mrb[71].mxu0 }
 0x28d   : > { %4215 = vst.msk [vmem:[%s7758_s19 + $0x178] sm:$0xff] %vm399_vm0, %v5571_v33  ;;  %4206 = vst.msk [vmem:[%s7758_s19 + $0x130] sm:$0xff] %vm399_vm0, %v3256_v59  ;;  %v3385_v60 = vpop.f32.mrb[71].mxu1 }
 0x28e   : > { %4214 = vst.msk [vmem:[%s7758_s19 + $0x170] sm:$0xff] %vm399_vm0, %v3385_v60 }
 0x29f   : > { %v5590_v36 = vpop.f32.mrb[72].mxu0 }
 0x2a0   : > { %4217 = vst.msk [vmem:[%s7758_s19 + $0x188] sm:$0xff] %vm399_vm0, %v5590_v36  ;;  %v5618_v37 = vpop.f32.mrb[72].mxu1  ;;  %v3484_v40 = vpop.f32.mrb[73].mxu0 }
 0x2a1   : > { %4225 = vst.msk [vmem:[%s7758_s19 + $0x1c8] sm:$0xff] %vm399_vm0, %v5618_v37  ;;  %4216 = vst.msk [vmem:[%s7758_s19 + $0x180] sm:$0xff] %vm399_vm0, %v3484_v40  ;;  %v3613_v18 = vpop.f32.mrb[73].mxu1 }
 0x2a2   : > { %4224 = vst.msk [vmem:[%s7758_s19 + $0x1c0] sm:$0xff] %vm399_vm0, %v3613_v18 }
 0x2a3   : > { %v5593_v53 = vpop.f32.mrb[74].mxu0 }
 0x2a4   : > { %4219 = vst.msk [vmem:[%s7758_s19 + $0x198] sm:$0xff] %vm399_vm0, %v5593_v53  ;;  %v5621_v15 = vpop.f32.mrb[74].mxu1  ;;  %v3494_v16 = vpop.f32.mrb[75].mxu0 }
 0x2a5   : > { %4227 = vst.msk [vmem:[%s7758_s19 + $0x1d8] sm:$0xff] %vm399_vm0, %v5621_v15  ;;  %4218 = vst.msk [vmem:[%s7758_s19 + $0x190] sm:$0xff] %vm399_vm0, %v3494_v16  ;;  %v3623_v51 = vpop.f32.mrb[75].mxu1 }
 0x2a6   : > { %4226 = vst.msk [vmem:[%s7758_s19 + $0x1d0] sm:$0xff] %vm399_vm0, %v3623_v51 }
 0x2a7   : > { %v5596_v10 = vpop.f32.mrb[76].mxu0 }
 0x2a8   : > { %4221 = vst.msk [vmem:[%s7758_s19 + $0x1a8] sm:$0xff] %vm399_vm0, %v5596_v10  ;;  %v5624_v63 = vpop.f32.mrb[76].mxu1  ;;  %v3504_v1 = vpop.f32.mrb[77].mxu0 }
 0x2a9   : > { %4229 = vst.msk [vmem:[%s7758_s19 + $0x1e8] sm:$0xff] %vm399_vm0, %v5624_v63  ;;  %4220 = vst.msk [vmem:[%s7758_s19 + $0x1a0] sm:$0xff] %vm399_vm0, %v3504_v1  ;;  %v3633_v39 = vpop.f32.mrb[77].mxu1 }
 0x2aa   : > { %4228 = vst.msk [vmem:[%s7758_s19 + $0x1e0] sm:$0xff] %vm399_vm0, %v3633_v39 }
 0x2ab   : > { %v5599_v41 = vpop.f32.mrb[78].mxu0 }
 0x2ac   : > { %4223 = vst.msk [vmem:[%s7758_s19 + $0x1b8] sm:$0xff] %vm399_vm0, %v5599_v41  ;;  %v5627_v57 = vpop.f32.mrb[78].mxu1  ;;  %v3514_v9 = vpop.f32.mrb[79].mxu0 }
 0x2ad   : > { %4231 = vst.msk [vmem:[%s7758_s19 + $0x1f8] sm:$0xff] %vm399_vm0, %v5627_v57  ;;  %4222 = vst.msk [vmem:[%s7758_s19 + $0x1b0] sm:$0xff] %vm399_vm0, %v3514_v9  ;;  %v3643_v5 = vpop.f32.mrb[79].mxu1 }
 0x2ae   : > { %4230 = vst.msk [vmem:[%s7758_s19 + $0x1f0] sm:$0xff] %vm399_vm0, %v3643_v5 }
 0x2bf   : > { %v5646_v7 = vpop.f32.mrb[80].mxu0 }
 0x2c0   : > { %4233 = vst.msk [vmem:[%s7758_s19 + $0x208] sm:$0xff] %vm399_vm0, %v5646_v7  ;;  %v5674_v11 = vpop.f32.mrb[80].mxu1  ;;  %v3742_v38 = vpop.f32.mrb[81].mxu0 }
 0x2c1   : > { %4241 = vst.msk [vmem:[%s7758_s19 + $0x248] sm:$0xff] %vm399_vm0, %v5674_v11  ;;  %4232 = vst.msk [vmem:[%s7758_s19 + $0x200] sm:$0xff] %vm399_vm0, %v3742_v38  ;;  %v3871_v6 = vpop.f32.mrb[81].mxu1 }
 0x2c2   : > { %4240 = vst.msk [vmem:[%s7758_s19 + $0x240] sm:$0xff] %vm399_vm0, %v3871_v6 }
 0x2c3   : > { %v5649_v43 = vpop.f32.mrb[82].mxu0 }
 0x2c4   : > { %4235 = vst.msk [vmem:[%s7758_s19 + $0x218] sm:$0xff] %vm399_vm0, %v5649_v43  ;;  %v5677_v44 = vpop.f32.mrb[82].mxu1  ;;  %v3752_v45 = vpop.f32.mrb[83].mxu0 }
 0x2c5   : > { %4243 = vst.msk [vmem:[%s7758_s19 + $0x258] sm:$0xff] %vm399_vm0, %v5677_v44  ;;  %4234 = vst.msk [vmem:[%s7758_s19 + $0x210] sm:$0xff] %vm399_vm0, %v3752_v45  ;;  %v3881_v46 = vpop.f32.mrb[83].mxu1 }
 0x2c6   : > { %4242 = vst.msk [vmem:[%s7758_s19 + $0x250] sm:$0xff] %vm399_vm0, %v3881_v46 }
 0x2c7   : > { %v5652_v4 = vpop.f32.mrb[84].mxu0 }
 0x2c8   : > { %4237 = vst.msk [vmem:[%s7758_s19 + $0x228] sm:$0xff] %vm399_vm0, %v5652_v4  ;;  %v5680_v47 = vpop.f32.mrb[84].mxu1  ;;  %v3762_v48 = vpop.f32.mrb[85].mxu0 }
 0x2c9   : > { %4245 = vst.msk [vmem:[%s7758_s19 + $0x268] sm:$0xff] %vm399_vm0, %v5680_v47  ;;  %4236 = vst.msk [vmem:[%s7758_s19 + $0x220] sm:$0xff] %vm399_vm0, %v3762_v48  ;;  %v3891_v27 = vpop.f32.mrb[85].mxu1 }
 0x2ca   : > { %4244 = vst.msk [vmem:[%s7758_s19 + $0x260] sm:$0xff] %vm399_vm0, %v3891_v27 }
 0x2cb   : > { %v5655_v28 = vpop.f32.mrb[86].mxu0 }
 0x2cc   : > { %4239 = vst.msk [vmem:[%s7758_s19 + $0x238] sm:$0xff] %vm399_vm0, %v5655_v28  ;;  %v5683_v49 = vpop.f32.mrb[86].mxu1  ;;  %v3772_v50 = vpop.f32.mrb[87].mxu0 }
 0x2cd   : > { %4247 = vst.msk [vmem:[%s7758_s19 + $0x278] sm:$0xff] %vm399_vm0, %v5683_v49  ;;  %4238 = vst.msk [vmem:[%s7758_s19 + $0x230] sm:$0xff] %vm399_vm0, %v3772_v50  ;;  %v3901_v13 = vpop.f32.mrb[87].mxu1 }
 0x2ce   : > { %4246 = vst.msk [vmem:[%s7758_s19 + $0x270] sm:$0xff] %vm399_vm0, %v3901_v13 }
 0x2df   : > { %v5702_v14 = vpop.f32.mrb[88].mxu0 }
 0x2e0   : > { %4249 = vst.msk [vmem:[%s7758_s19 + $0x288] sm:$0xff] %vm399_vm0, %v5702_v14  ;;  %v5730_v54 = vpop.f32.mrb[88].mxu1  ;;  %v4000_v55 = vpop.f32.mrb[89].mxu0 }
 0x2e1   : > { %4257 = vst.msk [vmem:[%s7758_s19 + $0x2c8] sm:$0xff] %vm399_vm0, %v5730_v54  ;;  %4248 = vst.msk [vmem:[%s7758_s19 + $0x280] sm:$0xff] %vm399_vm0, %v4000_v55  ;;  %v4129_v56 = vpop.f32.mrb[89].mxu1 }
 0x2e2   : > { %4256 = vst.msk [vmem:[%s7758_s19 + $0x2c0] sm:$0xff] %vm399_vm0, %v4129_v56 }
 0x2e3   : > { %v5705_v8 = vpop.f32.mrb[90].mxu0 }
 0x2e4   : > { %4251 = vst.msk [vmem:[%s7758_s19 + $0x298] sm:$0xff] %vm399_vm0, %v5705_v8  ;;  %v5733_v58 = vpop.f32.mrb[90].mxu1  ;;  %v4010_v34 = vpop.f32.mrb[91].mxu0 }
 0x2e5   : > { %4259 = vst.msk [vmem:[%s7758_s19 + $0x2d8] sm:$0xff] %vm399_vm0, %v5733_v58  ;;  %4250 = vst.msk [vmem:[%s7758_s19 + $0x290] sm:$0xff] %vm399_vm0, %v4010_v34  ;;  %v4139_v35 = vpop.f32.mrb[91].mxu1 }
 0x2e6   : > { %4258 = vst.msk [vmem:[%s7758_s19 + $0x2d0] sm:$0xff] %vm399_vm0, %v4139_v35 }
 0x2e7   : > { %v5708_v62 = vpop.f32.mrb[92].mxu0 }
 0x2e8   : > { %4253 = vst.msk [vmem:[%s7758_s19 + $0x2a8] sm:$0xff] %vm399_vm0, %v5708_v62  ;;  %v5736_v2 = vpop.f32.mrb[92].mxu1  ;;  %v4020_v12 = vpop.f32.mrb[93].mxu0 }
 0x2e9   : > { %4261 = vst.msk [vmem:[%s7758_s19 + $0x2e8] sm:$0xff] %vm399_vm0, %v5736_v2  ;;  %4252 = vst.msk [vmem:[%s7758_s19 + $0x2a0] sm:$0xff] %vm399_vm0, %v4020_v12  ;;  %v4149_v42 = vpop.f32.mrb[93].mxu1 }
 0x2ea   : > { %4260 = vst.msk [vmem:[%s7758_s19 + $0x2e0] sm:$0xff] %vm399_vm0, %v4149_v42 }
 0x2eb   : > { %v5711_v0 = vpop.f32.mrb[94].mxu0 }
 0x2ec   : > { %4255 = vst.msk [vmem:[%s7758_s19 + $0x2b8] sm:$0xff] %vm399_vm0, %v5711_v0  ;;  %v5739_v61 = vpop.f32.mrb[94].mxu1  ;;  %v4030_v19 = vpop.f32.mrb[95].mxu0 }
 0x2ed   : > { %4263 = vst.msk [vmem:[%s7758_s19 + $0x2f8] sm:$0xff] %vm399_vm0, %v5739_v61  ;;  %4254 = vst.msk [vmem:[%s7758_s19 + $0x2b0] sm:$0xff] %vm399_vm0, %v4030_v19  ;;  %v4159_v20 = vpop.f32.mrb[95].mxu1 }
 0x2ee   : > { %4262 = vst.msk [vmem:[%s7758_s19 + $0x2f0] sm:$0xff] %vm399_vm0, %v4159_v20 }
 0x2ef   : > { %6543 = shalt.err (!%p6540_p11)
}
 0x2f0   : > { %s6544_s6 = scalar_lea.hbm %s7949_s13, 12288  ;;  %s6548_s3 = scalar_lea.hbm %s8005_s2, 24576 }
 0x2f1   : > { %p6545_p3 = scmp.ne.s32.totalorder %s7949_s13, %s6544_s6  ;;  %p6549_p2 = scmp.lt.u32.totalorder %s7949_s13, %s8005_s2 }
 0x2f2   : > { %p6550_p4 = scmp.lt.u32.totalorder %s6548_s3, %s6544_s6  ;;  %p6552_p13 = scmp.lt.u32.totalorder %s6544_s6, %s7949_s13 }
 0x2f3   : > { %p6546_p8 = pnand %p6545_p3, %p8016_p1 }
 0x2f4   : > { %p6551_p6 = por %p6550_p4, %p6549_p2 }
 0x2f5   : > { %p6547_p0 = pneg %p6546_p8 }
 0x2f6   : > { %p6553_p12 = por %p6552_p13, %p6551_p6 }
 0x2f8   : > { %p6554_p10 = pnand %p6553_p12, %p6547_p0 }
 0x2fa   : > { %6557 = shalt.err (!%p6554_p10)
}
 0x2fb   : > { %s6607_s22 = smov 128   ;;  %s6608_s29 = smov 8  }
 0x2fc   : > { %6227 = dma.vmem_to_hbm [thread:$0]  (%p8016_p1), %s7951_s5, 12288, %s7949_s13, %s4265_s27, %s6607_s22, %s6607_s22, %s6608_s29  }
 0x2fd PF: > { %s4294_s19 = sand.u32 1, %s6588_s9   ;;  %p8017_p5 = scmp.ne.s32.totalorder %s8010_s21, 0 }
 0x2fe   : > { %p8018_p7 = scmp.ge.s32.totalorder %s6600_s12, 2  ;;  %s4295_s4 = scalar_lea.sflag [#allocation4], %s4294_s19 }
 0x300   : > { %p6237_p9 = pnand %p8018_p7, %p8017_p5 }
 0x302   : > { %6583 = dma.done.wait (!%p6237_p9), %s4295_s4, 12288  }
 0x303   : > { %6585 = vsyncadd (!%p6237_p9), %s4295_s4, 4294955008  ;;  %p18_p11 = scmp.ge.s32.totalorder %s6649_s15, 4   ;;  %s8019_s9 = smov %s6592_s10 }
 0x304   : > { %s8020_s10 = smov %s6596_s11  ;;  %s8021_s11 = smov %s6661_s18 }
 0x305   : > { %s8022_s12 = smov %s6649_s15  ;;  %20 = sbr.rel (!%p18_p11) target bundleno = 7 (0x7), region = 86 }
 0x30c   :  { %4300 = vsyncpa [#allocation3], 1 }
 0x30d   :  { %4302 = vsyncpa [#allocation3 + $0x1], 1 }
 0x30e   :  { %4303 = vsyncpa [#allocation6], 1 }
 0x30f   :  { %4305 = vsyncpa [#allocation6 + $0x1], 1 }
 0x310   :  { %4306 = vsyncpa [#allocation4], 1 }
 0x311   :  { %4308 = vsyncpa [#allocation4 + $0x1], 1 }

</bundles_post_ra>
